<compile_context>
chip_gen: v7x
topology: tpu7x:2x2x1
jax: 0.10.0
libtpu: 0.0.40
codegen_flags: <defaults>
</compile_context>

<pallas_src>
import math

import jax
import jax.numpy as jnp
from jax import lax
from jax.experimental import pallas as pl
from jax.experimental.pallas import tpu as pltpu


# ----------------------------- Pallas kernel --------------------------------

def _spatial_transformer_kernel(
    x_ref, ctx_ref,
    ln1_g, ln1_b, wqkv_s,
    ln2_g, ln2_b, wq_c, wk_c, wv_c,
    ln3_g, ln3_b, w1, b1, w2, b2,
    out_ref,
):
    bf16 = jnp.bfloat16
    f32 = jnp.float32
    E = wq_c.shape[0]                     # embed dim (Q/K width)

    x0 = x_ref[0]                         # (C, T) channel-major, f32
    ctx = ctx_ref[0]                      # (S, Cd) token-major context

    def layer_norm(x, g_ref, b_ref):
        # normalize over the channel (sublane) axis; stats are (1, T), lane-dense
        mu = jnp.mean(x, axis=0, keepdims=True)
        var = jnp.mean(x * x, axis=0, keepdims=True) - mu * mu
        xn = (x - mu) * lax.rsqrt(var + 1e-5)
        return xn * g_ref[...] + b_ref[...]

    def softmax_pv(k_rows, q_cols, v_cols):
        # k_rows (S, E) keys token-major, q_cols (E, T), v_cols (C, S).
        # 1/sqrt(E) is pre-folded into the Q projection weights.
        s = jnp.dot(k_rows, q_cols, preferred_element_type=f32)            # (S, T)
        m = jnp.max(s, axis=0, keepdims=True)                              # (1, T)
        e = jnp.exp(s - m)                                                  # f32 (v5e-safe)
        denom = jnp.sum(e, axis=0, keepdims=True)                           # (1, T)
        o = jnp.dot(v_cols, e.astype(bf16), preferred_element_type=f32)     # (C, T)
        return o * pl.reciprocal(denom, approx=True)                        # deferred norm

    # --- self attention + residual ---
    h1 = layer_norm(x0, ln1_g, ln1_b).astype(bf16)                          # (C, T)
    qkv = jnp.dot(wqkv_s[...], h1, preferred_element_type=f32)              # (2E+C, T)
    q_s = qkv[:E].astype(bf16)                                              # (E, T)
    k_s = jnp.transpose(qkv[E:2 * E]).astype(bf16)                          # (T, E) keys as rows
    v_s = qkv[2 * E:].astype(bf16)                                          # (C, T)
    x = softmax_pv(k_s, q_s, v_s) + x0

    # --- cross attention + residual ---
    h2 = layer_norm(x, ln2_g, ln2_b).astype(bf16)
    q_c = jnp.dot(wq_c[...], h2, preferred_element_type=f32).astype(bf16)       # (E, T)
    ctx_b = ctx.astype(bf16)
    k_c = jnp.dot(ctx_b, wk_c[...], preferred_element_type=f32).astype(bf16)    # (S, E)
    v_c = lax.dot_general(wv_c[...], ctx_b, (((1,), (1,)), ((), ())),
                          preferred_element_type=f32).astype(bf16)              # (C, S)
    x = softmax_pv(k_c, q_c, v_c) + x

    # --- feed forward (Linear -> exact erf-GELU -> Linear) + residual ---
    h3 = layer_norm(x, ln3_g, ln3_b).astype(bf16)
    f = jnp.dot(w1[...], h3, preferred_element_type=f32) + b1[...]              # (FF, T)
    f = 0.5 * f * (1.0 + lax.erf(f * (1.0 / math.sqrt(2.0))))                   # PyTorch GELU
    f = jnp.dot(w2[...], f.astype(bf16), preferred_element_type=f32) + b2[...]  # (C, T)
    x = f + x

    # --- outer SpatialTransformer residual; (C, T) store is lane-dense (T = 256) ---
    out_ref[0] = x + x0


# ----------------------- one-time weight preparation -------------------------

def prepare_params(params):
    """Fuse / transpose / bf16-cast weights once (outside the per-call hot path)."""
    bf16 = jnp.bfloat16
    f32 = jnp.float32
    E = params["wq_s"].shape[1]
    scale = 1.0 / math.sqrt(E)
    col = lambda a: jnp.asarray(a, f32).reshape(-1, 1)   # per-channel params as (C, 1)
    return {
        "ln1_g": col(params["ln1_g"]), "ln1_b": col(params["ln1_b"]),
        "ln2_g": col(params["ln2_g"]), "ln2_b": col(params["ln2_b"]),
        "ln3_g": col(params["ln3_g"]), "ln3_b": col(params["ln3_b"]),
        # fused self-attn QKV, output-major (2E+C, C); 1/sqrt(E) folded into Q rows
        "wqkv_s": jnp.concatenate(
            [params["wq_s"] * scale, params["wk_s"], params["wv_s"]],
            axis=1).T.astype(bf16),
        # cross-attn: Q output-major (scale folded); K left (Cd, E) so K is produced
        # token-major (S, E); V output-major (C, Cd) so V is produced channel-major (C, S)
        "wq_c": (params["wq_c"] * scale).T.astype(bf16),
        "wk_c": params["wk_c"].astype(bf16),
        "wv_c": params["wv_c"].T.astype(bf16),
        # FFN weights output-major
        "w1": params["w1"].T.astype(bf16), "b1": col(params["b1"]),
        "w2": params["w2"].T.astype(bf16), "b2": col(params["b2"]),
    }


# ------------------------------ wrapper --------------------------------------

def spatial_transformer(x_nchw, context, pp):
    """x_nchw: (B, C, H, W) f32; context: (B, S, Cd) f32; pp: prepare_params() output."""
    B, C, H, W = x_nchw.shape
    T = H * W
    S, Cd = context.shape[1], context.shape[2]
    E = pp["wq_c"].shape[0]
    FF = pp["w1"].shape[0]

    # NCHW -> channel-major tokens (B, C, T): a free reshape (no transpose).
    x_cm = x_nchw.reshape(B, C, T)

    def full2d(a):
        return pl.BlockSpec(a.shape, lambda b: (0, 0))

    in_specs = [
        pl.BlockSpec((1, C, T), lambda b: (b, 0, 0)),      # x (channel-major)
        pl.BlockSpec((1, S, Cd), lambda b: (b, 0, 0)),     # context
        full2d(pp["ln1_g"]), full2d(pp["ln1_b"]), full2d(pp["wqkv_s"]),
        full2d(pp["ln2_g"]), full2d(pp["ln2_b"]),
        full2d(pp["wq_c"]), full2d(pp["wk_c"]), full2d(pp["wv_c"]),
        full2d(pp["ln3_g"]), full2d(pp["ln3_b"]),
        full2d(pp["w1"]), full2d(pp["b1"]), full2d(pp["w2"]), full2d(pp["b2"]),
    ]

    # Advisory cost estimate so XLA schedules neighbouring ops around this tiny call.
    flops = 2 * B * (
        T * C * (2 * E + C)                       # fused self qkv
        + T * E * T + C * T * T                   # self scores + pv
        + T * C * E + S * Cd * E + S * Cd * C     # cross q, k, v
        + S * E * T + C * S * T                   # cross scores + pv
        + T * C * FF + T * FF * C                 # ffn
    )
    transcendentals = B * (T * T + S * T + FF * T + 8 * T)
    bytes_accessed = (
        4 * (2 * B * C * T + B * S * Cd)                                    # x in/out + ctx
        + 2 * ((2 * E + C) * C + E * C + Cd * E + C * Cd + 2 * C * FF)      # bf16 weights
        + 4 * (6 * C + FF + C)                                              # LN params + biases
    )

    out_cm = pl.pallas_call(
        _spatial_transformer_kernel,
        out_shape=jax.ShapeDtypeStruct((B, C, T), jnp.float32),
        grid=(B,),
        in_specs=in_specs,
        out_specs=pl.BlockSpec((1, C, T), lambda b: (b, 0, 0)),
        compiler_params=pltpu.CompilerParams(dimension_semantics=("parallel",)),
        cost_estimate=pl.CostEstimate(flops=int(flops),
                                      transcendentals=int(transcendentals),
                                      bytes_accessed=int(bytes_accessed)),
    )(
        x_cm, context,
        pp["ln1_g"], pp["ln1_b"], pp["wqkv_s"],
        pp["ln2_g"], pp["ln2_b"], pp["wq_c"], pp["wk_c"], pp["wv_c"],
        pp["ln3_g"], pp["ln3_b"], pp["w1"], pp["b1"], pp["w2"], pp["b2"],
    )

    # channel-major (B, C, T) -> NCHW is again a free reshape; outer residual already added.
    return out_cm.reshape(B, C, H, W)


spatial_transformer_jit = jax.jit(spatial_transformer)


# --------------------------- pure-JAX reference -------------------------------

def reference(x_nchw, context, params):
    B, C, H, W = x_nchw.shape
    x0 = jnp.transpose(x_nchw, (0, 2, 3, 1)).reshape(B, H * W, C)

    def ln(x, g, b):
        mu = x.mean(-1, keepdims=True)
        var = ((x - mu) ** 2).mean(-1, keepdims=True)
        return (x - mu) / jnp.sqrt(var + 1e-5) * g + b

    def attn(q_in, kv_in, wq, wk, wv):
        Q = q_in @ wq
        K = kv_in @ wk
        V = kv_in @ wv
        s = jnp.einsum("bth,bsh->bts", Q, K) / math.sqrt(Q.shape[-1])
        p = jax.nn.softmax(s, axis=-1)
        return jnp.einsum("bts,bsh->bth", p, V)

    p = params
    x = x0
    h1 = ln(x, p["ln1_g"], p["ln1_b"])
    x = attn(h1, h1, p["wq_s"], p["wk_s"], p["wv_s"]) + x
    h2 = ln(x, p["ln2_g"], p["ln2_b"])
    x = attn(h2, context, p["wq_c"], p["wk_c"], p["wv_c"]) + x
    h3 = ln(x, p["ln3_g"], p["ln3_b"])
    f = h3 @ p["w1"] + p["b1"]
    f = 0.5 * f * (1.0 + jax.lax.erf(f / math.sqrt(2.0)))
    x = f @ p["w2"] + p["b2"] + x
    x = x + x0
    return x.reshape(B, H, W, C).transpose(0, 3, 1, 2)


# ------------------------------- main -----------------------------------------

if __name__ == "__main__":
    B, C, H, W = 2, 32, 16, 16      # hidden_dim = C = 32, T = 256 tokens
    S, Cd = 8, 64                   # context: seq=8, context_dim=64
    FF = 3 * C                      # ffn inner dim

    key = jax.random.PRNGKey(0)
    ks = jax.random.split(key, 12)

    def lin(k, fan_in, fan_out):
        # nn.Linear-style uniform(-1/sqrt(fan_in), 1/sqrt(fan_in)); stored (in, out)
        bound = 1.0 / math.sqrt(fan_in)
        return jax.random.uniform(k, (fan_in, fan_out), jnp.float32, -bound, bound)

    params = {
        # LayerNorm params (PyTorch default init: weight=1, bias=0)
        "ln1_g": jnp.ones((C,), jnp.float32), "ln1_b": jnp.zeros((C,), jnp.float32),
        "ln2_g": jnp.ones((C,), jnp.float32), "ln2_b": jnp.zeros((C,), jnp.float32),
        "ln3_g": jnp.ones((C,), jnp.float32), "ln3_b": jnp.zeros((C,), jnp.float32),
        # self-attention (hidden -> embed/hidden), weights stored (in, out) so y = x @ W
        "wq_s": lin(ks[0], C, C), "wk_s": lin(ks[1], C, C), "wv_s": lin(ks[2], C, C),
        # cross-attention (query from hidden, key/value from context_dim)
        "wq_c": lin(ks[3], C, C), "wk_c": lin(ks[4], Cd, C), "wv_c": lin(ks[5], Cd, C),
        # FFN
        "w1": lin(ks[6], C, FF),
        "b1": jax.random.uniform(ks[7], (FF,), jnp.float32,
                                 -1.0 / math.sqrt(C), 1.0 / math.sqrt(C)),
        "w2": lin(ks[8], FF, C),
        "b2": jax.random.uniform(ks[9], (C,), jnp.float32,
                                 -1.0 / math.sqrt(FF), 1.0 / math.sqrt(FF)),
    }

    x = jax.random.normal(ks[10], (B, C, H, W), jnp.float32)
    context = jax.random.normal(ks[11], (B, S, Cd), jnp.float32)

    pp = prepare_params(params)     # one-time weight fusion / transposition / bf16 cast

    out = jax.block_until_ready(spatial_transformer_jit(x, context, pp))
    ref = jax.block_until_ready(reference(x, context, params))

    assert out.shape == (B, C, H, W)
    # Tolerance accounts for bf16 matmul operands (f32 accumulation) + approx reciprocal.
    max_err = float(jnp.max(jnp.abs(out - ref)))
    assert jnp.allclose(out, ref, rtol=4e-2, atol=4e-2), max_err

    print("KERNEL_OK")
</pallas_src>

<mosaic_0001>
module attributes {stable_mosaic.version = 11 : i64} {
  func.func @_spatial_transformer_kernel(%arg0: i32, %arg1: memref<1x32x256xf32, #tpu.memory_space<vmem>>, %arg2: memref<1x8x64xf32, #tpu.memory_space<vmem>>, %arg3: memref<32x1xf32, #tpu.memory_space<vmem>>, %arg4: memref<32x1xf32, #tpu.memory_space<vmem>>, %arg5: memref<96x32xbf16, #tpu.memory_space<vmem>>, %arg6: memref<32x1xf32, #tpu.memory_space<vmem>>, %arg7: memref<32x1xf32, #tpu.memory_space<vmem>>, %arg8: memref<32x32xbf16, #tpu.memory_space<vmem>>, %arg9: memref<64x32xbf16, #tpu.memory_space<vmem>>, %arg10: memref<32x64xbf16, #tpu.memory_space<vmem>>, %arg11: memref<32x1xf32, #tpu.memory_space<vmem>>, %arg12: memref<32x1xf32, #tpu.memory_space<vmem>>, %arg13: memref<96x32xbf16, #tpu.memory_space<vmem>>, %arg14: memref<96x1xf32, #tpu.memory_space<vmem>>, %arg15: memref<32x96xbf16, #tpu.memory_space<vmem>>, %arg16: memref<32x1xf32, #tpu.memory_space<vmem>>, %arg17: memref<1x32x256xf32, #tpu.memory_space<vmem>>) attributes {dimension_semantics = [#tpu.dimension_semantics<parallel>], iteration_bounds = array<i64: 2>, scalar_prefetch = 0 : i64, scratch_operands = 0 : i64, tpu.core_type = #tpu.core_type<tc>, window_params = [{transform_indices = @transform_0, window_bounds = array<i64: 1, 32, 256>}, {transform_indices = @transform_1, window_bounds = array<i64: 1, 8, 64>}, {pipeline_mode = #tpu.pipeline_mode<synchronous>, transform_indices = @transform_2, window_bounds = array<i64: 32, 1>}, {pipeline_mode = #tpu.pipeline_mode<synchronous>, transform_indices = @transform_3, window_bounds = array<i64: 32, 1>}, {pipeline_mode = #tpu.pipeline_mode<synchronous>, transform_indices = @transform_4, window_bounds = array<i64: 96, 32>}, {pipeline_mode = #tpu.pipeline_mode<synchronous>, transform_indices = @transform_5, window_bounds = array<i64: 32, 1>}, {pipeline_mode = #tpu.pipeline_mode<synchronous>, transform_indices = @transform_6, window_bounds = array<i64: 32, 1>}, {pipeline_mode = #tpu.pipeline_mode<synchronous>, transform_indices = @transform_7, window_bounds = array<i64: 32, 32>}, {pipeline_mode = #tpu.pipeline_mode<synchronous>, transform_indices = @transform_8, window_bounds = array<i64: 64, 32>}, {pipeline_mode = #tpu.pipeline_mode<synchronous>, transform_indices = @transform_9, window_bounds = array<i64: 32, 64>}, {pipeline_mode = #tpu.pipeline_mode<synchronous>, transform_indices = @transform_10, window_bounds = array<i64: 32, 1>}, {pipeline_mode = #tpu.pipeline_mode<synchronous>, transform_indices = @transform_11, window_bounds = array<i64: 32, 1>}, {pipeline_mode = #tpu.pipeline_mode<synchronous>, transform_indices = @transform_12, window_bounds = array<i64: 96, 32>}, {pipeline_mode = #tpu.pipeline_mode<synchronous>, transform_indices = @transform_13, window_bounds = array<i64: 96, 1>}, {pipeline_mode = #tpu.pipeline_mode<synchronous>, transform_indices = @transform_14, window_bounds = array<i64: 32, 96>}, {pipeline_mode = #tpu.pipeline_mode<synchronous>, transform_indices = @transform_15, window_bounds = array<i64: 32, 1>}, {transform_indices = @transform_16, window_bounds = array<i64: 1, 32, 256>}]} {
    %c0 = arith.constant 0 : index
    %c0_0 = arith.constant 0 : index
    %c0_1 = arith.constant 0 : index
    %0 = vector.load %arg1[%c0, %c0_0, %c0_1] : memref<1x32x256xf32, #tpu.memory_space<vmem>>, vector<1x32x256xf32>
    %1 = vector.shape_cast %0 : vector<1x32x256xf32> to vector<32x256xf32>
    %c0_2 = arith.constant 0 : index
    %c0_3 = arith.constant 0 : index
    %c0_4 = arith.constant 0 : index
    %2 = vector.load %arg2[%c0_2, %c0_3, %c0_4] : memref<1x8x64xf32, #tpu.memory_space<vmem>>, vector<1x8x64xf32>
    %3 = vector.shape_cast %2 : vector<1x8x64xf32> to vector<8x64xf32>
    %cst = arith.constant dense<0.000000e+00> : vector<256xf32>
    %4 = vector.multi_reduction <add>, %1, %cst [0] : vector<32x256xf32> to vector<256xf32>
    %5 = vector.shape_cast %4 : vector<256xf32> to vector<1x256xf32>
    %cst_5 = arith.constant 3.200000e+01 : f32
    %6 = vector.broadcast %cst_5 : f32 to vector<1x256xf32>
    %7 = arith.divf %5, %6 : vector<1x256xf32>
    %8 = arith.mulf %1, %1 : vector<32x256xf32>
    %cst_6 = arith.constant dense<0.000000e+00> : vector<256xf32>
    %9 = vector.multi_reduction <add>, %8, %cst_6 [0] : vector<32x256xf32> to vector<256xf32>
    %10 = vector.shape_cast %9 : vector<256xf32> to vector<1x256xf32>
    %cst_7 = arith.constant 3.200000e+01 : f32
    %11 = vector.broadcast %cst_7 : f32 to vector<1x256xf32>
    %12 = arith.divf %10, %11 : vector<1x256xf32>
    %13 = arith.mulf %7, %7 : vector<1x256xf32>
    %14 = arith.subf %12, %13 : vector<1x256xf32>
    %15 = vector.broadcast %7 : vector<1x256xf32> to vector<32x256xf32>
    %16 = arith.subf %1, %15 : vector<32x256xf32>
    %cst_8 = arith.constant 9.99999974E-6 : f32
    %17 = vector.broadcast %cst_8 : f32 to vector<1x256xf32>
    %18 = arith.addf %14, %17 : vector<1x256xf32>
    %19 = math.rsqrt %18 : vector<1x256xf32>
    %20 = vector.broadcast %19 : vector<1x256xf32> to vector<32x256xf32>
    %21 = arith.mulf %16, %20 : vector<32x256xf32>
    %c0_9 = arith.constant 0 : index
    %c0_10 = arith.constant 0 : index
    %22 = vector.load %arg3[%c0_9, %c0_10] : memref<32x1xf32, #tpu.memory_space<vmem>>, vector<32x1xf32>
    %23 = vector.broadcast %22 : vector<32x1xf32> to vector<32x256xf32>
    %24 = arith.mulf %21, %23 : vector<32x256xf32>
    %c0_11 = arith.constant 0 : index
    %c0_12 = arith.constant 0 : index
    %25 = vector.load %arg4[%c0_11, %c0_12] : memref<32x1xf32, #tpu.memory_space<vmem>>, vector<32x1xf32>
    %26 = vector.broadcast %25 : vector<32x1xf32> to vector<32x256xf32>
    %27 = arith.addf %24, %26 : vector<32x256xf32>
    %28 = arith.truncf %27 : vector<32x256xf32> to vector<32x256xbf16>
    %c0_13 = arith.constant 0 : index
    %c0_14 = arith.constant 0 : index
    %29 = vector.load %arg5[%c0_13, %c0_14] : memref<96x32xbf16, #tpu.memory_space<vmem>>, vector<96x32xbf16>
    %cst_15 = arith.constant dense<0.000000e+00> : vector<96x256xf32>
    %30 = tpu.matmul %29, %28, %cst_15 {dimension_numbers = #tpu.dot_dimension_numbers<[1], [0], [0], [1], [0, 0, 1, 1], [], []>} : vector<96x32xbf16>, vector<32x256xbf16>, vector<96x256xf32> -> vector<96x256xf32>
    %31 = vector.extract_strided_slice %30 {offsets = [0, 0], sizes = [32, 256], strides = [1, 1]} : vector<96x256xf32> to vector<32x256xf32>
    %32 = arith.truncf %31 : vector<32x256xf32> to vector<32x256xbf16>
    %33 = vector.extract_strided_slice %30 {offsets = [32, 0], sizes = [32, 256], strides = [1, 1]} : vector<96x256xf32> to vector<32x256xf32>
    %34 = tpu.transpose %33, [1, 0] : vector<32x256xf32> -> vector<256x32xf32>
    %35 = arith.truncf %34 : vector<256x32xf32> to vector<256x32xbf16>
    %36 = vector.extract_strided_slice %30 {offsets = [64, 0], sizes = [32, 256], strides = [1, 1]} : vector<96x256xf32> to vector<32x256xf32>
    %37 = arith.truncf %36 : vector<32x256xf32> to vector<32x256xbf16>
    %cst_16 = arith.constant dense<0.000000e+00> : vector<256x256xf32>
    %38 = tpu.matmul %35, %32, %cst_16 {dimension_numbers = #tpu.dot_dimension_numbers<[1], [0], [0], [1], [0, 0, 1, 1], [], []>} : vector<256x32xbf16>, vector<32x256xbf16>, vector<256x256xf32> -> vector<256x256xf32>
    %cst_17 = arith.constant dense<0xFF800000> : vector<256xf32>
    %39 = vector.multi_reduction <maximumf>, %38, %cst_17 [0] : vector<256x256xf32> to vector<256xf32>
    %40 = vector.shape_cast %39 : vector<256xf32> to vector<1x256xf32>
    %41 = vector.broadcast %40 : vector<1x256xf32> to vector<256x256xf32>
    %42 = arith.subf %38, %41 : vector<256x256xf32>
    %43 = math.exp %42 : vector<256x256xf32>
    %cst_18 = arith.constant dense<0.000000e+00> : vector<256xf32>
    %44 = vector.multi_reduction <add>, %43, %cst_18 [0] : vector<256x256xf32> to vector<256xf32>
    %45 = vector.shape_cast %44 : vector<256xf32> to vector<1x256xf32>
    %46 = arith.truncf %43 : vector<256x256xf32> to vector<256x256xbf16>
    %cst_19 = arith.constant dense<0.000000e+00> : vector<32x256xf32>
    %47 = tpu.matmul %37, %46, %cst_19 {dimension_numbers = #tpu.dot_dimension_numbers<[1], [0], [0], [1], [0, 0, 1, 1], [], []>} : vector<32x256xbf16>, vector<256x256xbf16>, vector<32x256xf32> -> vector<32x256xf32>
    %48 = tpu.reciprocal %45 {approx = true} : vector<1x256xf32> -> vector<1x256xf32>
    %49 = vector.broadcast %48 : vector<1x256xf32> to vector<32x256xf32>
    %50 = arith.mulf %47, %49 : vector<32x256xf32>
    %51 = arith.addf %50, %1 : vector<32x256xf32>
    %cst_20 = arith.constant dense<0.000000e+00> : vector<256xf32>
    %52 = vector.multi_reduction <add>, %51, %cst_20 [0] : vector<32x256xf32> to vector<256xf32>
    %53 = vector.shape_cast %52 : vector<256xf32> to vector<1x256xf32>
    %cst_21 = arith.constant 3.200000e+01 : f32
    %54 = vector.broadcast %cst_21 : f32 to vector<1x256xf32>
    %55 = arith.divf %53, %54 : vector<1x256xf32>
    %56 = arith.mulf %51, %51 : vector<32x256xf32>
    %cst_22 = arith.constant dense<0.000000e+00> : vector<256xf32>
    %57 = vector.multi_reduction <add>, %56, %cst_22 [0] : vector<32x256xf32> to vector<256xf32>
    %58 = vector.shape_cast %57 : vector<256xf32> to vector<1x256xf32>
    %cst_23 = arith.constant 3.200000e+01 : f32
    %59 = vector.broadcast %cst_23 : f32 to vector<1x256xf32>
    %60 = arith.divf %58, %59 : vector<1x256xf32>
    %61 = arith.mulf %55, %55 : vector<1x256xf32>
    %62 = arith.subf %60, %61 : vector<1x256xf32>
    %63 = vector.broadcast %55 : vector<1x256xf32> to vector<32x256xf32>
    %64 = arith.subf %51, %63 : vector<32x256xf32>
    %cst_24 = arith.constant 9.99999974E-6 : f32
    %65 = vector.broadcast %cst_24 : f32 to vector<1x256xf32>
    %66 = arith.addf %62, %65 : vector<1x256xf32>
    %67 = math.rsqrt %66 : vector<1x256xf32>
    %68 = vector.broadcast %67 : vector<1x256xf32> to vector<32x256xf32>
    %69 = arith.mulf %64, %68 : vector<32x256xf32>
    %c0_25 = arith.constant 0 : index
    %c0_26 = arith.constant 0 : index
    %70 = vector.load %arg6[%c0_25, %c0_26] : memref<32x1xf32, #tpu.memory_space<vmem>>, vector<32x1xf32>
    %71 = vector.broadcast %70 : vector<32x1xf32> to vector<32x256xf32>
    %72 = arith.mulf %69, %71 : vector<32x256xf32>
    %c0_27 = arith.constant 0 : index
    %c0_28 = arith.constant 0 : index
    %73 = vector.load %arg7[%c0_27, %c0_28] : memref<32x1xf32, #tpu.memory_space<vmem>>, vector<32x1xf32>
    %74 = vector.broadcast %73 : vector<32x1xf32> to vector<32x256xf32>
    %75 = arith.addf %72, %74 : vector<32x256xf32>
    %76 = arith.truncf %75 : vector<32x256xf32> to vector<32x256xbf16>
    %c0_29 = arith.constant 0 : index
    %c0_30 = arith.constant 0 : index
    %77 = vector.load %arg8[%c0_29, %c0_30] : memref<32x32xbf16, #tpu.memory_space<vmem>>, vector<32x32xbf16>
    %cst_31 = arith.constant dense<0.000000e+00> : vector<32x256xf32>
    %78 = tpu.matmul %77, %76, %cst_31 {dimension_numbers = #tpu.dot_dimension_numbers<[1], [0], [0], [1], [0, 0, 1, 1], [], []>} : vector<32x32xbf16>, vector<32x256xbf16>, vector<32x256xf32> -> vector<32x256xf32>
    %79 = arith.truncf %78 : vector<32x256xf32> to vector<32x256xbf16>
    %80 = arith.truncf %3 : vector<8x64xf32> to vector<8x64xbf16>
    %c0_32 = arith.constant 0 : index
    %c0_33 = arith.constant 0 : index
    %81 = vector.load %arg9[%c0_32, %c0_33] : memref<64x32xbf16, #tpu.memory_space<vmem>>, vector<64x32xbf16>
    %cst_34 = arith.constant dense<0.000000e+00> : vector<8x32xf32>
    %82 = tpu.matmul %80, %81, %cst_34 {dimension_numbers = #tpu.dot_dimension_numbers<[1], [0], [0], [1], [0, 0, 1, 1], [], []>} : vector<8x64xbf16>, vector<64x32xbf16>, vector<8x32xf32> -> vector<8x32xf32>
    %83 = arith.truncf %82 : vector<8x32xf32> to vector<8x32xbf16>
    %c0_35 = arith.constant 0 : index
    %c0_36 = arith.constant 0 : index
    %84 = vector.load %arg10[%c0_35, %c0_36] : memref<32x64xbf16, #tpu.memory_space<vmem>>, vector<32x64xbf16>
    %cst_37 = arith.constant dense<0.000000e+00> : vector<32x8xf32>
    %85 = tpu.matmul %84, %80, %cst_37 {dimension_numbers = #tpu.dot_dimension_numbers<[1], [1], [0], [0], [0, 0, 1, 0], [], []>} : vector<32x64xbf16>, vector<8x64xbf16>, vector<32x8xf32> -> vector<32x8xf32>
    %86 = arith.truncf %85 : vector<32x8xf32> to vector<32x8xbf16>
    %cst_38 = arith.constant dense<0.000000e+00> : vector<8x256xf32>
    %87 = tpu.matmul %83, %79, %cst_38 {dimension_numbers = #tpu.dot_dimension_numbers<[1], [0], [0], [1], [0, 0, 1, 1], [], []>} : vector<8x32xbf16>, vector<32x256xbf16>, vector<8x256xf32> -> vector<8x256xf32>
    %cst_39 = arith.constant dense<0xFF800000> : vector<256xf32>
    %88 = vector.multi_reduction <maximumf>, %87, %cst_39 [0] : vector<8x256xf32> to vector<256xf32>
    %89 = vector.shape_cast %88 : vector<256xf32> to vector<1x256xf32>
    %90 = vector.broadcast %89 : vector<1x256xf32> to vector<8x256xf32>
    %91 = arith.subf %87, %90 : vector<8x256xf32>
    %92 = math.exp %91 : vector<8x256xf32>
    %cst_40 = arith.constant dense<0.000000e+00> : vector<256xf32>
    %93 = vector.multi_reduction <add>, %92, %cst_40 [0] : vector<8x256xf32> to vector<256xf32>
    %94 = vector.shape_cast %93 : vector<256xf32> to vector<1x256xf32>
    %95 = arith.truncf %92 : vector<8x256xf32> to vector<8x256xbf16>
    %cst_41 = arith.constant dense<0.000000e+00> : vector<32x256xf32>
    %96 = tpu.matmul %86, %95, %cst_41 {dimension_numbers = #tpu.dot_dimension_numbers<[1], [0], [0], [1], [0, 0, 1, 1], [], []>} : vector<32x8xbf16>, vector<8x256xbf16>, vector<32x256xf32> -> vector<32x256xf32>
    %97 = tpu.reciprocal %94 {approx = true} : vector<1x256xf32> -> vector<1x256xf32>
    %98 = vector.broadcast %97 : vector<1x256xf32> to vector<32x256xf32>
    %99 = arith.mulf %96, %98 : vector<32x256xf32>
    %100 = arith.addf %99, %51 : vector<32x256xf32>
    %cst_42 = arith.constant dense<0.000000e+00> : vector<256xf32>
    %101 = vector.multi_reduction <add>, %100, %cst_42 [0] : vector<32x256xf32> to vector<256xf32>
    %102 = vector.shape_cast %101 : vector<256xf32> to vector<1x256xf32>
    %cst_43 = arith.constant 3.200000e+01 : f32
    %103 = vector.broadcast %cst_43 : f32 to vector<1x256xf32>
    %104 = arith.divf %102, %103 : vector<1x256xf32>
    %105 = arith.mulf %100, %100 : vector<32x256xf32>
    %cst_44 = arith.constant dense<0.000000e+00> : vector<256xf32>
    %106 = vector.multi_reduction <add>, %105, %cst_44 [0] : vector<32x256xf32> to vector<256xf32>
    %107 = vector.shape_cast %106 : vector<256xf32> to vector<1x256xf32>
    %cst_45 = arith.constant 3.200000e+01 : f32
    %108 = vector.broadcast %cst_45 : f32 to vector<1x256xf32>
    %109 = arith.divf %107, %108 : vector<1x256xf32>
    %110 = arith.mulf %104, %104 : vector<1x256xf32>
    %111 = arith.subf %109, %110 : vector<1x256xf32>
    %112 = vector.broadcast %104 : vector<1x256xf32> to vector<32x256xf32>
    %113 = arith.subf %100, %112 : vector<32x256xf32>
    %cst_46 = arith.constant 9.99999974E-6 : f32
    %114 = vector.broadcast %cst_46 : f32 to vector<1x256xf32>
    %115 = arith.addf %111, %114 : vector<1x256xf32>
    %116 = math.rsqrt %115 : vector<1x256xf32>
    %117 = vector.broadcast %116 : vector<1x256xf32> to vector<32x256xf32>
    %118 = arith.mulf %113, %117 : vector<32x256xf32>
    %c0_47 = arith.constant 0 : index
    %c0_48 = arith.constant 0 : index
    %119 = vector.load %arg11[%c0_47, %c0_48] : memref<32x1xf32, #tpu.memory_space<vmem>>, vector<32x1xf32>
    %120 = vector.broadcast %119 : vector<32x1xf32> to vector<32x256xf32>
    %121 = arith.mulf %118, %120 : vector<32x256xf32>
    %c0_49 = arith.constant 0 : index
    %c0_50 = arith.constant 0 : index
    %122 = vector.load %arg12[%c0_49, %c0_50] : memref<32x1xf32, #tpu.memory_space<vmem>>, vector<32x1xf32>
    %123 = vector.broadcast %122 : vector<32x1xf32> to vector<32x256xf32>
    %124 = arith.addf %121, %123 : vector<32x256xf32>
    %125 = arith.truncf %124 : vector<32x256xf32> to vector<32x256xbf16>
    %c0_51 = arith.constant 0 : index
    %c0_52 = arith.constant 0 : index
    %126 = vector.load %arg13[%c0_51, %c0_52] : memref<96x32xbf16, #tpu.memory_space<vmem>>, vector<96x32xbf16>
    %cst_53 = arith.constant dense<0.000000e+00> : vector<96x256xf32>
    %127 = tpu.matmul %126, %125, %cst_53 {dimension_numbers = #tpu.dot_dimension_numbers<[1], [0], [0], [1], [0, 0, 1, 1], [], []>} : vector<96x32xbf16>, vector<32x256xbf16>, vector<96x256xf32> -> vector<96x256xf32>
    %c0_54 = arith.constant 0 : index
    %c0_55 = arith.constant 0 : index
    %128 = vector.load %arg14[%c0_54, %c0_55] : memref<96x1xf32, #tpu.memory_space<vmem>>, vector<96x1xf32>
    %129 = vector.broadcast %128 : vector<96x1xf32> to vector<96x256xf32>
    %130 = arith.addf %127, %129 : vector<96x256xf32>
    %cst_56 = arith.constant 5.000000e-01 : f32
    %131 = vector.broadcast %cst_56 : f32 to vector<96x256xf32>
    %132 = arith.mulf %131, %130 : vector<96x256xf32>
    %cst_57 = arith.constant 0.707106769 : f32
    %133 = vector.broadcast %cst_57 : f32 to vector<96x256xf32>
    %134 = arith.mulf %130, %133 : vector<96x256xf32>
    %135 = math.erf %134 : vector<96x256xf32>
    %cst_58 = arith.constant 1.000000e+00 : f32
    %136 = vector.broadcast %cst_58 : f32 to vector<96x256xf32>
    %137 = arith.addf %136, %135 : vector<96x256xf32>
    %138 = arith.mulf %132, %137 : vector<96x256xf32>
    %c0_59 = arith.constant 0 : index
    %c0_60 = arith.constant 0 : index
    %139 = vector.load %arg15[%c0_59, %c0_60] : memref<32x96xbf16, #tpu.memory_space<vmem>>, vector<32x96xbf16>
    %140 = arith.truncf %138 : vector<96x256xf32> to vector<96x256xbf16>
    %cst_61 = arith.constant dense<0.000000e+00> : vector<32x256xf32>
    %141 = tpu.matmul %139, %140, %cst_61 {dimension_numbers = #tpu.dot_dimension_numbers<[1], [0], [0], [1], [0, 0, 1, 1], [], []>} : vector<32x96xbf16>, vector<96x256xbf16>, vector<32x256xf32> -> vector<32x256xf32>
    %c0_62 = arith.constant 0 : index
    %c0_63 = arith.constant 0 : index
    %142 = vector.load %arg16[%c0_62, %c0_63] : memref<32x1xf32, #tpu.memory_space<vmem>>, vector<32x1xf32>
    %143 = vector.broadcast %142 : vector<32x1xf32> to vector<32x256xf32>
    %144 = arith.addf %141, %143 : vector<32x256xf32>
    %145 = arith.addf %144, %100 : vector<32x256xf32>
    %146 = arith.addf %145, %1 : vector<32x256xf32>
    %c0_64 = arith.constant 0 : index
    %c0_65 = arith.constant 0 : index
    %c0_66 = arith.constant 0 : index
    %147 = vector.load %arg17[%c0_64, %c0_65, %c0_66] : memref<1x32x256xf32, #tpu.memory_space<vmem>>, vector<1x32x256xf32>
    %148 = vector.shape_cast %147 : vector<1x32x256xf32> to vector<32x256xf32>
    %149 = vector.shape_cast %146 : vector<32x256xf32> to vector<1x32x256xf32>
    tpu.vector_store %arg17[%c0_64, %c0_65, %c0_66], %149 {strides = array<i32>} : memref<1x32x256xf32, #tpu.memory_space<vmem>>, vector<1x32x256xf32>,
    return
  }
  func.func @transform_0(%arg0: i32) -> (i32, i32, i32) {
    %c0_i32 = arith.constant 0 : i32
    %c0_i32_0 = arith.constant 0 : i32
    %c0_i32_1 = arith.constant 0 : i32
    return %arg0, %c0_i32, %c0_i32_0 : i32, i32, i32
  }
  func.func @transform_1(%arg0: i32) -> (i32, i32, i32) {
    %c0_i32 = arith.constant 0 : i32
    %c0_i32_0 = arith.constant 0 : i32
    %c0_i32_1 = arith.constant 0 : i32
    return %arg0, %c0_i32, %c0_i32_0 : i32, i32, i32
  }
  func.func @transform_2(%arg0: i32) -> (i32, i32) {
    %c0_i32 = arith.constant 0 : i32
    %c0_i32_0 = arith.constant 0 : i32
    %c0_i32_1 = arith.constant 0 : i32
    return %c0_i32, %c0_i32_0 : i32, i32
  }
  func.func @transform_3(%arg0: i32) -> (i32, i32) {
    %c0_i32 = arith.constant 0 : i32
    %c0_i32_0 = arith.constant 0 : i32
    %c0_i32_1 = arith.constant 0 : i32
    return %c0_i32, %c0_i32_0 : i32, i32
  }
  func.func @transform_4(%arg0: i32) -> (i32, i32) {
    %c0_i32 = arith.constant 0 : i32
    %c0_i32_0 = arith.constant 0 : i32
    %c0_i32_1 = arith.constant 0 : i32
    return %c0_i32, %c0_i32_0 : i32, i32
  }
  func.func @transform_5(%arg0: i32) -> (i32, i32) {
    %c0_i32 = arith.constant 0 : i32
    %c0_i32_0 = arith.constant 0 : i32
    %c0_i32_1 = arith.constant 0 : i32
    return %c0_i32, %c0_i32_0 : i32, i32
  }
  func.func @transform_6(%arg0: i32) -> (i32, i32) {
    %c0_i32 = arith.constant 0 : i32
    %c0_i32_0 = arith.constant 0 : i32
    %c0_i32_1 = arith.constant 0 : i32
    return %c0_i32, %c0_i32_0 : i32, i32
  }
  func.func @transform_7(%arg0: i32) -> (i32, i32) {
    %c0_i32 = arith.constant 0 : i32
    %c0_i32_0 = arith.constant 0 : i32
    %c0_i32_1 = arith.constant 0 : i32
    return %c0_i32, %c0_i32_0 : i32, i32
  }
  func.func @transform_8(%arg0: i32) -> (i32, i32) {
    %c0_i32 = arith.constant 0 : i32
    %c0_i32_0 = arith.constant 0 : i32
    %c0_i32_1 = arith.constant 0 : i32
    return %c0_i32, %c0_i32_0 : i32, i32
  }
  func.func @transform_9(%arg0: i32) -> (i32, i32) {
    %c0_i32 = arith.constant 0 : i32
    %c0_i32_0 = arith.constant 0 : i32
    %c0_i32_1 = arith.constant 0 : i32
    return %c0_i32, %c0_i32_0 : i32, i32
  }
  func.func @transform_10(%arg0: i32) -> (i32, i32) {
    %c0_i32 = arith.constant 0 : i32
    %c0_i32_0 = arith.constant 0 : i32
    %c0_i32_1 = arith.constant 0 : i32
    return %c0_i32, %c0_i32_0 : i32, i32
  }
  func.func @transform_11(%arg0: i32) -> (i32, i32) {
    %c0_i32 = arith.constant 0 : i32
    %c0_i32_0 = arith.constant 0 : i32
    %c0_i32_1 = arith.constant 0 : i32
    return %c0_i32, %c0_i32_0 : i32, i32
  }
  func.func @transform_12(%arg0: i32) -> (i32, i32) {
    %c0_i32 = arith.constant 0 : i32
    %c0_i32_0 = arith.constant 0 : i32
    %c0_i32_1 = arith.constant 0 : i32
    return %c0_i32, %c0_i32_0 : i32, i32
  }
  func.func @transform_13(%arg0: i32) -> (i32, i32) {
    %c0_i32 = arith.constant 0 : i32
    %c0_i32_0 = arith.constant 0 : i32
    %c0_i32_1 = arith.constant 0 : i32
    return %c0_i32, %c0_i32_0 : i32, i32
  }
  func.func @transform_14(%arg0: i32) -> (i32, i32) {
    %c0_i32 = arith.constant 0 : i32
    %c0_i32_0 = arith.constant 0 : i32
    %c0_i32_1 = arith.constant 0 : i32
    return %c0_i32, %c0_i32_0 : i32, i32
  }
  func.func @transform_15(%arg0: i32) -> (i32, i32) {
    %c0_i32 = arith.constant 0 : i32
    %c0_i32_0 = arith.constant 0 : i32
    %c0_i32_1 = arith.constant 0 : i32
    return %c0_i32, %c0_i32_0 : i32, i32
  }
  func.func @transform_16(%arg0: i32) -> (i32, i32, i32) {
    %c0_i32 = arith.constant 0 : i32
    %c0_i32_0 = arith.constant 0 : i32
    %c0_i32_1 = arith.constant 0 : i32
    return %arg0, %c0_i32, %c0_i32_0 : i32, i32, i32
  }
}

</mosaic_0001>

<bundles_post_ra>
// kernel: spatial_transformer.1
= control target key start
LH: loop header
LB: loop body
LE: loop exit
PB: predicated region body
PF: predicated region fallthrough
CT: control target
= control target key end

     0   :  { %s3278_s21 = smov 0   ;;  %s4462_s0 = inlined_call_operand.vmem [shape: f32[2,32,256], index: 0, kind: input, shape index: {}]   ;;  %s4463_s1 = inlined_call_operand.vmem [shape: f32[2,8,64], index: 1, kind: input, shape index: {}]   ;;  %s4464_s2 = inlined_call_operand.vmem [shape: f32[32,1], index: 2, kind: input, shape index: {}]   ;;  %s4465_s3 = inlined_call_operand.vmem [shape: f32[32,1], index: 3, kind: input, shape index: {}]   ;;  %s4466_s4 = inlined_call_operand.vmem [shape: bf16[96,32], index: 4, kind: input, shape index: {}]   ;;  %s4467_s5 = inlined_call_operand.vmem [shape: f32[32,1], index: 5, kind: input, shape index: {}]   ;;  %s4468_s6 = inlined_call_operand.vmem [shape: f32[32,1], index: 6, kind: input, shape index: {}]   ;;  %s4469_s7 = inlined_call_operand.vmem [shape: bf16[32,32], index: 7, kind: input, shape index: {}]   ;;  %s4470_s8 = inlined_call_operand.vmem [shape: bf16[64,32], index: 8, kind: input, shape index: {}]   ;;  %s4471_s9 = inlined_call_operand.vmem [shape: bf16[32,64], index: 9, kind: input, shape index: {}]   ;;  %s4472_s10 = inlined_call_operand.vmem [shape: f32[32,1], index: 10, kind: input, shape index: {}]   ;;  %s4473_s11 = inlined_call_operand.vmem [shape: f32[32,1], index: 11, kind: input, shape index: {}]   ;;  %s4474_s12 = inlined_call_operand.vmem [shape: bf16[96,32], index: 12, kind: input, shape index: {}]   ;;  %s4475_s13 = inlined_call_operand.vmem [shape: f32[96,1], index: 13, kind: input, shape index: {}]   ;;  %s4476_s14 = inlined_call_operand.vmem [shape: bf16[32,96], index: 14, kind: input, shape index: {}]   ;;  %s4477_s15 = inlined_call_operand.vmem [shape: f32[32,1], index: 15, kind: input, shape index: {}]   ;;  %s4478_s16 = inlined_call_operand.vmem [shape: f32[2,32,256], index: 16, kind: output, shape index: {}]  }
   0x1   :  { %4527 = sst [smem:[#allocation28_spill]] %s4462_s0 }
   0x2 LB: > { %s2829_s22 = sadd.s32 4294967295, %s3188_s21   ;;  %p2833_p0 = scmp.ge.s32.totalorder %s3188_s21, 1  ;;  %s3188_s21 = sphi %s3278_s21, %s26_s21  }
   0x3   : > { %p471_p1 = scmp.lt.s32.totalorder %s3188_s21, 3 }
   0x5   : > { %p472_p2 = pnand %p2833_p0, %p471_p1 }
   0x7   : > { %475 = sbr.rel (%p472_p2) target bundleno = 2537 (0x9e9), region = 84 }
   0xe   : > { %v654_v0 = vld [vmem:[%s4465_s3] sm:$0xff]  ;;  %v4479_v2 = vmov 0   ;;  %v655_v3 = vld [vmem:[%s4465_s3 + $0x8] sm:$0xff]  ;;  %v625_v5 = vld [vmem:[%s4464_s2 + $0x18] sm:$0xff]  ;;  %p525_p3 = scmp.lt.s32.totalorder %s2829_s22, 1  ;;  %s4528_s29 = sld [smem:[#allocation28_spill]] }
   0xf   : > { %v622_v1 = vld [vmem:[%s4464_s2] sm:$0xff]  ;;  %2943 = vset.pattern.permute.xlu1 %v4479_v2  ;;  %2942 = vset.pattern.permute.xlu0 %v4479_v2  ;;  %v623_v4 = vld [vmem:[%s4464_s2 + $0x8] sm:$0xff]  ;;  %v624_v6 = vld [vmem:[%s4464_s2 + $0x10] sm:$0xff]  ;;  %vm732_vm0 = vcmask 261120   ;;  %vm3192_vm1 = vmmov 0   ;;  %vm1866_vm2 = vcmask 523264  }
  0x10   : > { %660 = vperm.xlu1 %2943, %v654_v0   ;;  %628 = vperm.xlu0 %2942, %v622_v1   ;;  %v657_v7 = vld [vmem:[%s4465_s3 + $0x18] sm:$0xff]  ;;  %v656_v8 = vld [vmem:[%s4465_s3 + $0x10] sm:$0xff]  ;;  %s4650_s22 = smov (!%p525_p3, %s2829_s22), 1  ;;  %vm2065_vm3 = vcmask 1043456   ;;  %vm2058_vm4 = vcmask 64512   ;;  %vm2678_vm5 = vcmask 785408  }
  0x11   : > { %783 = vmatprep.mubr.bf16.mxu0 %v4479_v2  ;;  %1012 = vmatprep.mubr.bf16.mxu1 %v4479_v2  ;;  %s2902_s26 = sshll.u32 %s4650_s22, 6  ;;  %s2836_s23 = sshll.u32 %s4650_s22, 3 }
  0x12   : > { %s533_s17 = scalar_lea.vmem %s4463_s1, %s2836_s23  ;;  %s4434_s20 = scalar_lea.vmem %s4478_s16, %s2902_s26 }
  0x14   : > { %665 = vperm.xlu1 %2943, %v655_v3   ;;  %633 = vperm.xlu0 %2942, %v623_v4   ;;  %s3322_s30 = scalar_lea.vmem %s4528_s29, %s2902_s26 }
  0x15   : > { %v3325_v9 = vld [vmem:[%s3322_s30] sm:$0xff]  ;;  %v3328_v10 = vld [vmem:[%s3322_s30 + $0x10] sm:$0xff]  ;;  %v3331_v11 = vld [vmem:[%s3322_s30 + $0x8] sm:$0xff] }
  0x16   : > { %v3334_v12 = vld [vmem:[%s3322_s30 + $0x18] sm:$0xff]  ;;  %v549_v13 = vadd.f32 %v3328_v10, %v3325_v9  ;;  %v570_v14 = vmul.f32 %v3325_v9, %v3325_v9  ;;  %v572_v15 = vmul.f32 %v3328_v10, %v3328_v10  ;;  %v3343_v16 = vld [vmem:[%s3322_s30 + $0x20] sm:$0xff]  ;;  %v571_v18 = vmul.f32 %v3331_v11, %v3331_v11  ;;  %v3352_v20 = vld [vmem:[%s3322_s30 + $0x28] sm:$0xff] }
  0x17   : > { %v558_v17 = vadd.f32 %v3334_v12, %v3331_v11  ;;  %v573_v19 = vmul.f32 %v3334_v12, %v3334_v12  ;;  %v574_v22 = vmul.f32 %v3343_v16, %v3343_v16  ;;  %v3358_v24 = vld [vmem:[%s3322_s30 + $0x30] sm:$0xff]  ;;  %v575_v26 = vmul.f32 %v3352_v20, %v3352_v20  ;;  %v3364_v28 = vld [vmem:[%s3322_s30 + $0x38] sm:$0xff] }
  0x18   : > { %643 = vperm.xlu1 %2943, %v625_v5   ;;  %638 = vperm.xlu0 %2942, %v624_v6   ;;  %v550_v21 = vadd.f32 %v549_v13, %v3343_v16  ;;  %v578_v23 = vadd.f32 %v572_v15, %v570_v14  ;;  %v576_v30 = vmul.f32 %v3358_v24, %v3358_v24 }
  0x19   : > { %v559_v25 = vadd.f32 %v558_v17, %v3352_v20  ;;  %v587_v27 = vadd.f32 %v573_v19, %v571_v18  ;;  %v577_v33 = vmul.f32 %v3364_v28, %v3364_v28 }
  0x1a   : > { %v551_v29 = vadd.f32 %v550_v21, %v3358_v24  ;;  %v579_v31 = vadd.f32 %v578_v23, %v574_v22 }
  0x1b   : > { %v560_v32 = vadd.f32 %v559_v25, %v3364_v28  ;;  %v588_v34 = vadd.f32 %v587_v27, %v575_v26 }
  0x1c   : > { %675 = vperm.xlu1 %2943, %v657_v7   ;;  %670 = vperm.xlu0 %2942, %v656_v8   ;;  %v552_v35 = vrot.slane %v551_v29, 4  ;;  %v580_v36 = vadd.f32 %v579_v31, %v576_v30 }
  0x1d   : > { %v561_v37 = vrot.slane %v560_v32, 4  ;;  %v589_v38 = vadd.f32 %v588_v34, %v577_v33 }
  0x1e   : > { %v553_v39 = vadd.f32 %v552_v35, %v551_v29  ;;  %v581_v40 = vrot.slane %v580_v36, 4 }
  0x1f   : > { %v562_v41 = vadd.f32 %v561_v37, %v560_v32  ;;  %v590_v42 = vrot.slane %v589_v38, 4 }
  0x20   : > { %v554_v43 = vrot.slane %v553_v39, 2  ;;  %v582_v44 = vadd.f32 %v581_v40, %v580_v36 }
  0x21   : > { %v563_v45 = vrot.slane %v562_v41, 2  ;;  %v591_v46 = vadd.f32 %v590_v42, %v589_v38 }
  0x22   : > { %v555_v47 = vadd.f32 %v554_v43, %v553_v39  ;;  %v583_v48 = vrot.slane %v582_v44, 2 }
  0x23   : > { %v564_v49 = vadd.f32 %v563_v45, %v562_v41  ;;  %v592_v50 = vrot.slane %v591_v46, 2 }
  0x24   : > { %v556_v51 = vrot.slane %v555_v47, 1  ;;  %v584_v52 = vadd.f32 %v583_v48, %v582_v44 }
  0x25   : > { %v565_v53 = vrot.slane %v564_v49, 1  ;;  %v593_v54 = vadd.f32 %v592_v50, %v591_v46 }
  0x26   : > { %v557_v55 = vadd.f32 %v556_v51, %v555_v47  ;;  %v585_v56 = vrot.slane %v584_v52, 1 }
  0x27   : > { %v566_v57 = vadd.f32 %v565_v53, %v564_v49  ;;  %v594_v58 = vrot.slane %v593_v54, 1 }
  0x28   : > { %v568_v59 = vmul.f32 0.03125, %v557_v55  ;;  %v586_v60 = vadd.f32 %v585_v56, %v584_v52  ;;  %v2945_v55 = vld [vmem:[%s4466_s4 + $0x8] sm:$0xff]   ;;  %v2946_v56 = vld [vmem:[%s4466_s4 + $0x10] sm:$0xff]  }
  0x29   : > { %v569_v61 = vmul.f32 0.03125, %v566_v57  ;;  %v595_v62 = vadd.f32 %v594_v58, %v593_v54  ;;  %v2944_v54 = vld [vmem:[%s4466_s4] sm:$0xff]   ;;  %v2947_v57 = vld [vmem:[%s4466_s4 + $0x18] sm:$0xff]  }
  0x2a   : > { %v596_v63 = vmul.f32 0.03125, %v586_v60  ;;  %v598_v0 = vmul.f32 %v568_v59, %v568_v59  ;;  %v602_v13 = vsub.f32 %v3325_v9, %v568_v59  ;;  %v604_v17 = vsub.f32 %v3328_v10, %v568_v59 }
  0x2b   : > { %v597_v1 = vmul.f32 0.03125, %v595_v62  ;;  %v599_v3 = vmul.f32 %v569_v61, %v569_v61  ;;  %v603_v14 = vsub.f32 %v3331_v11, %v569_v61  ;;  %v605_v18 = vsub.f32 %v3334_v12, %v569_v61 }
  0x2c   : > { %v600_v4 = vsub.f32 %v596_v63, %v598_v0  ;;  %v608_v27 = vsub.f32 %v3358_v24, %v568_v59  ;;  %v606_v29 = vsub.f32 %v3343_v16, %v568_v59  ;;  %v609_v30 = vsub.f32 %v3364_v28, %v569_v61 }
  0x2d   : > { %v601_v5 = vsub.f32 %v597_v1, %v599_v3  ;;  %v607_v9 = vsub.f32 %v3352_v20, %v569_v61 }
  0x2e   : > { %v610_v6 = vadd.f32 1e-05, %v600_v4 }
  0x2f   : > { %v611_v7 = vadd.f32 1e-05, %v601_v5 }
  0x30   : > { %2966 = vrsqrt.f32 %v610_v6 }
  0x31   : > { %2968 = vrsqrt.f32 %v611_v7 }
  0x3a   : > { %v2967_v8 = vpop.eup %2966 }
  0x3b   : > { %v2969_v15 = vpop.eup %2968  ;;  %v614_v22 = vmul.f32 %v2967_v8, %v602_v13  ;;  %v616_v25 = vmul.f32 %v2967_v8, %v604_v17  ;;  %v620_v34 = vmul.f32 %v2967_v8, %v608_v27  ;;  %v618_v35 = vmul.f32 %v2967_v8, %v606_v29  ;;  %v1720_v27 = vld [vmem:[%s4468_s6] sm:$0xff]  ;;  %v2216_v29 = vld [vmem:[%s4472_s10 + $0x8] sm:$0xff] }
  0x3c   : > { %v615_v23 = vmul.f32 %v2969_v15, %v603_v14  ;;  %v617_v26 = vmul.f32 %v2969_v15, %v605_v18  ;;  %v621_v36 = vmul.f32 %v2969_v15, %v609_v30  ;;  %v619_v37 = vmul.f32 %v2969_v15, %v607_v9  ;;  %v1690_v30 = vld [vmem:[%s4467_s5 + $0x10] sm:$0xff]  ;;  %v2248_v9 = vld [vmem:[%s4473_s11 + $0x8] sm:$0xff] }
  0x8f   : > { %v661_v19 = vpop.permute.xlu1 %660  ;;  %v629_v21 = vpop.permute.xlu0 %628 }
  0x90   : > { %v646_v11 = vmul.f32 %v629_v21, %v614_v22  ;;  %v647_v31 = vmul.f32 %v629_v21, %v615_v23  ;;  %v1689_v21 = vld [vmem:[%s4467_s5 + $0x8] sm:$0xff]  ;;  %v1691_v23 = vld [vmem:[%s4467_s5 + $0x18] sm:$0xff] }
  0x91   : > { %v1721_v22 = vld [vmem:[%s4468_s6 + $0x8] sm:$0xff] }
  0x92   : > { %v679_v41 = vadd.f32 %v661_v19, %v647_v31  ;;  %v678_v16 = vadd.f32 %v661_v19, %v646_v11  ;;  %v1722_v11 = vld [vmem:[%s4468_s6 + $0x10] sm:$0xff]  ;;  %v2218_v31 = vld [vmem:[%s4472_s10 + $0x18] sm:$0xff] }
  0x93   : > { %v666_v32 = vpop.permute.xlu1 %665  ;;  %v634_v10 = vpop.permute.xlu0 %633 }
  0x94   : > { %v648_v33 = vmul.f32 %v634_v10, %v616_v25  ;;  %v649_v12 = vmul.f32 %v634_v10, %v617_v26  ;;  %v1688_v25 = vld [vmem:[%s4467_s5] sm:$0xff]  ;;  %v1723_v26 = vld [vmem:[%s4468_s6 + $0x18] sm:$0xff] }
  0x95   : > { %v2250_v10 = vld [vmem:[%s4473_s11 + $0x18] sm:$0xff] }
  0x96   : > { %v681_v38 = vadd.f32 %v666_v32, %v649_v12  ;;  %v680_v39 = vadd.f32 %v666_v32, %v648_v33  ;;  %v2215_v32 = vld [vmem:[%s4472_s10] sm:$0xff]  ;;  %v2296_v12 = vld [vmem:[%s4475_s13 + $0x8] sm:$0xff] }
  0x97   : > { %v644_v40 = vpop.permute.xlu1 %643  ;;  %v639_v24 = vpop.permute.xlu0 %638  ;;  %v2247_v33 = vld [vmem:[%s4473_s11] sm:$0xff] }
  0x98   : > { %v687_v42 = vpack.c.bf16 %v681_v38, %v679_v41  ;;  %v686_v28 = vpack.c.bf16 %v680_v39, %v678_v16  ;;  %v652_v43 = vmul.f32 %v644_v40, %v620_v34  ;;  %v653_v20 = vmul.f32 %v644_v40, %v621_v36  ;;  %v2217_v34 = vld [vmem:[%s4472_s10 + $0x10] sm:$0xff]  ;;  %v2300_v38 = vld [vmem:[%s4475_s13 + $0x28] sm:$0xff]  ;;  %v2295_v39 = vld [vmem:[%s4475_s13] sm:$0xff] }
  0x99   : > { %v650_v44 = vmul.f32 %v639_v24, %v618_v35  ;;  %v651_v45 = vmul.f32 %v639_v24, %v619_v37  ;;  %v2298_v35 = vld [vmem:[%s4475_s13 + $0x18] sm:$0xff]  ;;  %v2249_v36 = vld [vmem:[%s4473_s11 + $0x10] sm:$0xff] }
  0x9a   : > { %751 = vmatprep.subr.bf16.mxu0 %v687_v42  ;;  %v2302_v24 = vld [vmem:[%s4475_s13 + $0x38] sm:$0xff]  ;;  %v2297_v16 = vld [vmem:[%s4475_s13 + $0x10] sm:$0xff] }
  0x9b   : > { %v676_v46 = vpop.permute.xlu1 %675  ;;  %v671_v47 = vpop.permute.xlu0 %670  ;;  %752 = vmatpush1.bf16.msra.mxu0 %v686_v28  ;;  %v2304_v28 = vld [vmem:[%s4475_s13 + $0x48] sm:$0xff] }
  0x9c   : > { %v684_v48 = vadd.f32 %v676_v46, %v652_v43  ;;  %v685_v49 = vadd.f32 %v676_v46, %v653_v20  ;;  %v682_v50 = vadd.f32 %v671_v47, %v650_v44  ;;  %v683_v51 = vadd.f32 %v671_v47, %v651_v45  ;;  %v2299_v43 = vld [vmem:[%s4475_s13 + $0x20] sm:$0xff]  ;;  %v2306_v44 = vld [vmem:[%s4475_s13 + $0x58] sm:$0xff]  ;;  %v2301_v46 = vld [vmem:[%s4475_s13 + $0x30] sm:$0xff] }
  0x9e   : > { %v688_v52 = vpack.c.bf16 %v684_v48, %v682_v50  ;;  %v689_v53 = vpack.c.bf16 %v685_v49, %v683_v51  ;;  %v2645_v48 = vld [vmem:[%s4477_s15 + $0x8] sm:$0xff]  ;;  %v2303_v49 = vld [vmem:[%s4475_s13 + $0x40] sm:$0xff]  ;;  %v2647_v51 = vld [vmem:[%s4477_s15 + $0x18] sm:$0xff] }
  0xa0   : > { %753 = vmatprep.subr.bf16.mxu0 %v689_v53  ;;  %v2305_v53 = vld [vmem:[%s4475_s13 + $0x50] sm:$0xff] }
  0xa1   : > { %754 = vmatpush1.bf16.msra.mxu0 %v688_v52 }
  0xa4   : > { %2845 = vmatmul.mubr.msk.bf16.vlgmr.msra.gmra.mrb[0].mxu0 %vm732_vm0, %v2944_v54 }
  0xa5   : > { %793 = vmatprep.mubr.bf16.mxu0 %v4479_v2 }
  0xac   : > { %2846 = vmatmul.mubr.msk.bf16.gmra.mrb[4].mxu0 %vm732_vm0, %v2945_v55  ;;  %v2644_v55 = vld [vmem:[%s4477_s15] sm:$0xff] }
  0xad   : > { %803 = vmatprep.mubr.bf16.mxu0 %v4479_v2 }
  0xb4   : > { %2847 = vmatmul.mubr.msk.bf16.gmra.mrb[8].mxu0 %vm732_vm0, %v2946_v56 }
  0xb5   : > { %813 = vmatprep.mubr.bf16.mxu0 %v4479_v2 }
  0xbc   : > { %2848 = vmatmul.mubr.msk.bf16.gmra.mrb[12].mxu0 %vm732_vm0, %v2947_v57 }
  0xbd   : > { %823 = vmatprep.mubr.bf16.mxu0 %v4479_v2 }
 0x177   : > { %v785_v58 = vpop.f32.mrb[0].mxu0 }
 0x178   : > { %v787_v59 = vpop.f32.mrb[1].mxu0 }
 0x179   : > { %v789_v60 = vpop.f32.mrb[2].mxu0 }
 0x17a   : > { %v844_v61 = vpack.c.bf16 %v789_v60, %v785_v58  ;;  %v791_v62 = vpop.f32.mrb[3].mxu0  ;;  %v2646_v58 = vld [vmem:[%s4477_s15 + $0x10] sm:$0xff]  ;;  %v2948_v60 = vld [vmem:[%s4466_s4 + $0x20] sm:$0xff]  }
 0x17b   : > { %v845_v63 = vpack.c.bf16 %v791_v62, %v787_v59  ;;  %2849 = vmatmul.mubr.msk.bf16.gmra.mrb[16].mxu0 %vm732_vm0, %v2948_v60 }
 0x17c   : > { %833 = vmatprep.mubr.bf16.mxu0 %v4479_v2 }
 0x17d   : > { %980 = vmatprep.subr.bf16.mxu1 %v845_v63 }
 0x17e   : > { %981 = vmatpush1.bf16.msra.mxu1 %v844_v61 }
 0x17f   : > { %v795_v0 = vpop.f32.mrb[4].mxu0 }
 0x180   : > { %v797_v1 = vpop.f32.mrb[5].mxu0 }
 0x181   : > { %v799_v3 = vpop.f32.mrb[6].mxu0 }
 0x182   : > { %v846_v4 = vpack.c.bf16 %v799_v3, %v795_v0  ;;  %v801_v5 = vpop.f32.mrb[7].mxu0 }
 0x183   : > { %v847_v6 = vpack.c.bf16 %v801_v5, %v797_v1 }
 0x185   : > { %982 = vmatprep.subr.bf16.mxu1 %v847_v6 }
 0x186   : > { %983 = vmatpush1.bf16.msra.mxu1 %v846_v4 }
 0x187   : > { %v805_v7 = vpop.f32.mrb[8].mxu0 }
 0x188   : > { %848 = vxpose.xlu0.b32.start [1/4] (short) %v805_v7, 128  ;;  %v807_v8 = vpop.f32.mrb[9].mxu0 }
 0x189   : > { %880 = vxpose.xlu1.b32.start [1/4] (short) %v807_v8, 128  ;;  %v809_v13 = vpop.f32.mrb[10].mxu0 }
 0x18a   : > { %v811_v14 = vpop.f32.mrb[11].mxu0 }
 0x18c   : > { %849 = vxpose.xlu0.b32.cont [2/4] (short) %v809_v13, 128 }
 0x18d   : > { %881 = vxpose.xlu1.b32.cont [2/4] (short) %v811_v14, 128 }
 0x18f   : > { %v815_v15 = vpop.f32.mrb[12].mxu0 }
 0x190   : > { %850 = vxpose.xlu0.b32.cont [3/4] (short) %v815_v15, 128  ;;  %v817_v17 = vpop.f32.mrb[13].mxu0 }
 0x191   : > { %882 = vxpose.xlu1.b32.cont [3/4] (short) %v817_v17, 128  ;;  %v819_v18 = vpop.f32.mrb[14].mxu0 }
 0x192   : > { %v821_v19 = vpop.f32.mrb[15].mxu0 }
 0x194   : > { %851 = vxpose.xlu0.b32.end [4/4] (short) %v819_v18, 128 }
 0x195   : > { %883 = vxpose.xlu1.b32.end [4/4] (short) %v821_v19, 128 }
 0x1e3   : > { %1699 = vperm.xlu1 %2943, %v1689_v21  }
 0x1e7   : > { %1731 = vperm.xlu1 %2943, %v1721_v22  }
 0x1eb   : > { %1709 = vperm.xlu1 %2943, %v1691_v23  }
 0x1ed   : > { %1694 = vperm.xlu0 %2942, %v1688_v25  }
 0x1ef   : > { %1741 = vperm.xlu1 %2943, %v1723_v26  }
 0x1f1   : > { %1726 = vperm.xlu0 %2942, %v1720_v27  }
 0x1f3   : > { %2226 = vperm.xlu1 %2943, %v2216_v29  }
 0x1f5   : > { %1704 = vperm.xlu0 %2942, %v1690_v30  }
 0x1f7   : > { %2258 = vperm.xlu1 %2943, %v2248_v9   ;;  %v2949_v9 = vld [vmem:[%s4466_s4 + $0x28] sm:$0xff]  }
 0x1f8   : > { %2850 = vmatmul.mubr.msk.bf16.gmra.mrb[20].mxu0 %vm732_vm0, %v2949_v9 }
 0x1f9   : > { %1736 = vperm.xlu0 %2942, %v1722_v11  }
 0x1fb   : > { %2236 = vperm.xlu1 %2943, %v2218_v31  }
 0x1fd   : > { %2221 = vperm.xlu0 %2942, %v2215_v32  }
 0x1ff   : > { %2268 = vperm.xlu1 %2943, %v2250_v10  }
 0x201   : > { %2253 = vperm.xlu0 %2942, %v2247_v33  }
 0x203   : > { %2314 = vperm.xlu1 %2943, %v2296_v12  }
 0x205   : > { %2231 = vperm.xlu0 %2942, %v2217_v34  }
 0x207   : > { %2324 = vperm.xlu1 %2943, %v2298_v35  }
 0x208   : > { %v864_v37 = vpop.trf.xlu0 }
 0x209   : > { %2263 = vperm.xlu0 %2942, %v2249_v36   ;;  %v896_v61 = vpop.trf.xlu1 }
 0x20b   : > { %2334 = vperm.xlu1 %2943, %v2300_v38  }
 0x20c   : > { %v865_v40 = vpop.trf.xlu0 }
 0x20d   : > { %v912_v41 = vpack.c.bf16 %v865_v40, %v864_v37  ;;  %2309 = vperm.xlu0 %2942, %v2295_v39   ;;  %v897_v0 = vpop.trf.xlu1 }
 0x20e   : > { %v920_v21 = vpack.c.bf16 %v897_v0, %v896_v61 }
 0x20f   : > { %2851 = vmatmul.mubr.msk.bf16.vlgmr.msra.gmra.mrb[0].mxu1 %vm732_vm0, %v912_v41  ;;  %2344 = vperm.xlu1 %2943, %v2302_v24  }
 0x210   : > { %v866_v42 = vpop.trf.xlu0  ;;  %1022 = vmatprep.mubr.bf16.mxu1 %v4479_v2 }
 0x211   : > { %2319 = vperm.xlu0 %2942, %v2297_v16   ;;  %v898_v5 = vpop.trf.xlu1 }
 0x213   : > { %2354 = vperm.xlu1 %2943, %v2304_v28  }
 0x214   : > { %v867_v20 = vpop.trf.xlu0 }
 0x215   : > { %v913_v45 = vpack.c.bf16 %v867_v20, %v866_v42  ;;  %2329 = vperm.xlu0 %2942, %v2299_v43   ;;  %v899_v7 = vpop.trf.xlu1 }
 0x216   : > { %v921_v25 = vpack.c.bf16 %v899_v7, %v898_v5 }
 0x217   : > { %2852 = vmatmul.mubr.msk.bf16.gmra.mrb[4].mxu1 %vm732_vm0, %v913_v45  ;;  %2364 = vperm.xlu1 %2943, %v2306_v44  }
 0x218   : > { %v868_v47 = vpop.trf.xlu0  ;;  %1032 = vmatprep.mubr.bf16.mxu1 %v4479_v2 }
 0x219   : > { %2339 = vperm.xlu0 %2942, %v2301_v46   ;;  %v900_v15 = vpop.trf.xlu1 }
 0x21b   : > { %2655 = vperm.xlu1 %2943, %v2645_v48  }
 0x21c   : > { %v869_v50 = vpop.trf.xlu0 }
 0x21d   : > { %v914_v52 = vpack.c.bf16 %v869_v50, %v868_v47  ;;  %2349 = vperm.xlu0 %2942, %v2303_v49   ;;  %v901_v19 = vpop.trf.xlu1 }
 0x21e   : > { %v922_v27 = vpack.c.bf16 %v901_v19, %v900_v15 }
 0x21f   : > { %2853 = vmatmul.mubr.msk.bf16.gmra.mrb[8].mxu1 %vm732_vm0, %v914_v52  ;;  %2665 = vperm.xlu1 %2943, %v2647_v51  }
 0x220   : > { %v870_v54 = vpop.trf.xlu0  ;;  %1042 = vmatprep.mubr.bf16.mxu1 %v4479_v2 }
 0x221   : > { %2359 = vperm.xlu0 %2942, %v2305_v53   ;;  %v902_v22 = vpop.trf.xlu1 }
 0x224   : > { %v871_v56 = vpop.trf.xlu0 }
 0x225   : > { %v915_v57 = vpack.c.bf16 %v871_v56, %v870_v54  ;;  %2650 = vperm.xlu0 %2942, %v2644_v55   ;;  %v903_v23 = vpop.trf.xlu1 }
 0x226   : > { %v923_v30 = vpack.c.bf16 %v903_v23, %v902_v22 }
 0x227   : > { %2854 = vmatmul.mubr.msk.bf16.gmra.mrb[12].mxu1 %vm732_vm0, %v915_v57 }
 0x228   : > { %v872_v59 = vpop.trf.xlu0  ;;  %1052 = vmatprep.mubr.bf16.mxu1 %v4479_v2 }
 0x229   : > { %2660 = vperm.xlu0 %2942, %v2646_v58   ;;  %v904_v26 = vpop.trf.xlu1 }
 0x22c   : > { %v873_v62 = vpop.trf.xlu0 }
 0x22d   : > { %v916_v63 = vpack.c.bf16 %v873_v62, %v872_v59  ;;  %v905_v29 = vpop.trf.xlu1 }
 0x22e   : > { %v924_v32 = vpack.c.bf16 %v905_v29, %v904_v26 }
 0x22f   : > { %2855 = vmatmul.mubr.msk.bf16.gmra.mrb[16].mxu1 %vm732_vm0, %v916_v63 }
 0x230   : > { %v874_v1 = vpop.trf.xlu0  ;;  %1062 = vmatprep.mubr.bf16.mxu1 %v4479_v2 }
 0x231   : > { %v906_v11 = vpop.trf.xlu1 }
 0x234   : > { %v875_v3 = vpop.trf.xlu0 }
 0x235   : > { %v917_v4 = vpack.c.bf16 %v875_v3, %v874_v1  ;;  %v907_v31 = vpop.trf.xlu1 }
 0x236   : > { %v925_v33 = vpack.c.bf16 %v907_v31, %v906_v11 }
 0x237   : > { %2856 = vmatmul.mubr.msk.bf16.gmra.mrb[20].mxu1 %vm732_vm0, %v917_v4 }
 0x238   : > { %v876_v6 = vpop.trf.xlu0  ;;  %1072 = vmatprep.mubr.bf16.mxu1 %v4479_v2 }
 0x239   : > { %v908_v10 = vpop.trf.xlu1 }
 0x23c   : > { %v877_v8 = vpop.trf.xlu0 }
 0x23d   : > { %v918_v13 = vpack.c.bf16 %v877_v8, %v876_v6  ;;  %v909_v12 = vpop.trf.xlu1 }
 0x23e   : > { %v926_v34 = vpack.c.bf16 %v909_v12, %v908_v10 }
 0x23f   : > { %2857 = vmatmul.mubr.msk.bf16.gmra.mrb[24].mxu1 %vm732_vm0, %v918_v13 }
 0x240   : > { %v878_v14 = vpop.trf.xlu0  ;;  %1082 = vmatprep.mubr.bf16.mxu1 %v4479_v2 }
 0x241   : > { %v910_v35 = vpop.trf.xlu1 }
 0x244   : > { %v879_v17 = vpop.trf.xlu0 }
 0x245   : > { %v919_v18 = vpack.c.bf16 %v879_v17, %v878_v14  ;;  %v911_v36 = vpop.trf.xlu1 }
 0x246   : > { %v927_v37 = vpack.c.bf16 %v911_v36, %v910_v35 }
 0x247   : > { %2858 = vmatmul.mubr.msk.bf16.gmra.mrb[28].mxu1 %vm732_vm0, %v919_v18 }
 0x248   : > { %1092 = vmatprep.mubr.bf16.mxu1 %v4479_v2 }
 0x24f   : > { %2859 = vmatmul.mubr.msk.bf16.gmra.mrb[32].mxu1 %vm732_vm0, %v920_v21 }
 0x250   : > { %1102 = vmatprep.mubr.bf16.mxu1 %v4479_v2 }
 0x257   : > { %2860 = vmatmul.mubr.msk.bf16.gmra.mrb[36].mxu1 %vm732_vm0, %v921_v25 }
 0x258   : > { %1112 = vmatprep.mubr.bf16.mxu1 %v4479_v2 }
 0x25f   : > { %2861 = vmatmul.mubr.msk.bf16.gmra.mrb[40].mxu1 %vm732_vm0, %v922_v27 }
 0x260   : > { %1122 = vmatprep.mubr.bf16.mxu1 %v4479_v2 }
 0x267   : > { %2862 = vmatmul.mubr.msk.bf16.gmra.mrb[44].mxu1 %vm732_vm0, %v923_v30 }
 0x268   : > { %1132 = vmatprep.mubr.bf16.mxu1 %v4479_v2 }
 0x26f   : > { %2863 = vmatmul.mubr.msk.bf16.gmra.mrb[48].mxu1 %vm732_vm0, %v924_v32 }
 0x270   : > { %1142 = vmatprep.mubr.bf16.mxu1 %v4479_v2 }
 0x277   : > { %2864 = vmatmul.mubr.msk.bf16.gmra.mrb[52].mxu1 %vm732_vm0, %v925_v33 }
 0x278   : > { %1152 = vmatprep.mubr.bf16.mxu1 %v4479_v2 }
 0x27f   : > { %2865 = vmatmul.mubr.msk.bf16.gmra.mrb[56].mxu1 %vm732_vm0, %v926_v34 }
 0x280   : > { %1162 = vmatprep.mubr.bf16.mxu1 %v4479_v2 }
 0x287   : > { %2866 = vmatmul.mubr.msk.bf16.gmra.mrb[60].mxu1 %vm732_vm0, %v927_v37 }
 0x288   : > { %2447 = vmatprep.mubr.bf16.mxu1 %v4479_v2 }
 0x2e2   : > { %v3537_v38 = vpop.f32.mrb[0].mxu1 }
 0x2e3   : > { %v3539_v39 = vpop.f32.mrb[1].mxu1 }
 0x2e4   : > { %v3541_v40 = vpop.f32.mrb[2].mxu1 }
 0x2e5   : > { %v3543_v24 = vpop.f32.mrb[3].mxu1 }
 0x2ea   : > { %v3545_v41 = vpop.f32.mrb[4].mxu1 }
 0x2eb   : > { %v1173_v16 = vmax.f32 %v3537_v38, %v3545_v41  ;;  %v3549_v42 = vpop.f32.mrb[5].mxu1 }
 0x2ec   : > { %v1210_v28 = vmax.f32 %v3539_v39, %v3549_v42  ;;  %v3553_v43 = vpop.f32.mrb[6].mxu1 }
 0x2ed   : > { %v1174_v20 = vmax.f32 %v3541_v40, %v3553_v43  ;;  %v3557_v44 = vpop.f32.mrb[7].mxu1 }
 0x2ee   : > { %v1211_v45 = vmax.f32 %v3543_v24, %v3557_v44 }
 0x2f2   : > { %v3561_v46 = vpop.f32.mrb[8].mxu1 }
 0x2f3   : > { %v1175_v47 = vmax.f32 %v1173_v16, %v3561_v46  ;;  %v3564_v48 = vpop.f32.mrb[9].mxu1 }
 0x2f4   : > { %v1212_v49 = vmax.f32 %v1210_v28, %v3564_v48  ;;  %v3567_v50 = vpop.f32.mrb[10].mxu1 }
 0x2f5   : > { %v1176_v51 = vmax.f32 %v1174_v20, %v3567_v50  ;;  %v3570_v52 = vpop.f32.mrb[11].mxu1 }
 0x2f6   : > { %v1213_v53 = vmax.f32 %v1211_v45, %v3570_v52 }
 0x2fa   : > { %v3573_v54 = vpop.f32.mrb[12].mxu1 }
 0x2fb   : > { %v1177_v55 = vmax.f32 %v1175_v47, %v3573_v54  ;;  %v3576_v56 = vpop.f32.mrb[13].mxu1 }
 0x2fc   : > { %v1214_v57 = vmax.f32 %v1212_v49, %v3576_v56  ;;  %v3579_v58 = vpop.f32.mrb[14].mxu1 }
 0x2fd   : > { %v1178_v59 = vmax.f32 %v1176_v51, %v3579_v58  ;;  %v3582_v60 = vpop.f32.mrb[15].mxu1 }
 0x2fe   : > { %v1215_v61 = vmax.f32 %v1213_v53, %v3582_v60 }
 0x302   : > { %v3585_v62 = vpop.f32.mrb[16].mxu1 }
 0x303   : > { %v1179_v63 = vmax.f32 %v1177_v55, %v3585_v62  ;;  %v3588_v0 = vpop.f32.mrb[17].mxu1 }
 0x304   : > { %v1216_v1 = vmax.f32 %v1214_v57, %v3588_v0  ;;  %v3591_v3 = vpop.f32.mrb[18].mxu1 }
 0x305   : > { %v1180_v4 = vmax.f32 %v1178_v59, %v3591_v3  ;;  %v3594_v5 = vpop.f32.mrb[19].mxu1 }
 0x306   : > { %v1217_v6 = vmax.f32 %v1215_v61, %v3594_v5 }
 0x30a   : > { %v3597_v7 = vpop.f32.mrb[20].mxu1 }
 0x30b   : > { %v1181_v8 = vmax.f32 %v1179_v63, %v3597_v7  ;;  %v3600_v13 = vpop.f32.mrb[21].mxu1 }
 0x30c   : > { %v1218_v14 = vmax.f32 %v1216_v1, %v3600_v13  ;;  %v3603_v15 = vpop.f32.mrb[22].mxu1 }
 0x30d   : > { %v1182_v17 = vmax.f32 %v1180_v4, %v3603_v15  ;;  %v3606_v18 = vpop.f32.mrb[23].mxu1 }
 0x30e   : > { %4529 = vst [vmem:[#allocation2_spill] sm:$0xff] %v3606_v18  ;;  %v1219_v19 = vmax.f32 %v1217_v6, %v3606_v18 }
 0x312   : > { %v3609_v21 = vpop.f32.mrb[24].mxu1 }
 0x313   : > { %v1183_v22 = vmax.f32 %v1181_v8, %v3609_v21  ;;  %v3612_v23 = vpop.f32.mrb[25].mxu1 }
 0x314   : > { %4530 = vst [vmem:[#allocation3_spill] sm:$0xff] %v3612_v23  ;;  %v1220_v25 = vmax.f32 %v1218_v14, %v3612_v23  ;;  %v3615_v26 = vpop.f32.mrb[26].mxu1 }
 0x315   : > { %v1184_v27 = vmax.f32 %v1182_v17, %v3615_v26  ;;  %v3618_v29 = vpop.f32.mrb[27].mxu1 }
 0x316   : > { %4531 = vst [vmem:[#allocation4_spill] sm:$0xff] %v3618_v29  ;;  %v1221_v30 = vmax.f32 %v1219_v19, %v3618_v29 }
 0x31a   : > { %v3621_v9 = vpop.f32.mrb[28].mxu1 }
 0x31b   : > { %v1185_v11 = vmax.f32 %v1183_v22, %v3621_v9  ;;  %v3624_v31 = vpop.f32.mrb[29].mxu1 }
 0x31c   : > { %4532 = vst [vmem:[#allocation5_spill] sm:$0xff] %v3624_v31  ;;  %v1222_v32 = vmax.f32 %v1220_v25, %v3624_v31  ;;  %v3627_v10 = vpop.f32.mrb[30].mxu1 }
 0x31d   : > { %v1186_v33 = vmax.f32 %v1184_v27, %v3627_v10  ;;  %v3630_v12 = vpop.f32.mrb[31].mxu1 }
 0x31e   : > { %4533 = vst [vmem:[#allocation6_spill] sm:$0xff] %v3630_v12  ;;  %v1223_v34 = vmax.f32 %v1221_v30, %v3630_v12 }
 0x322   : > { %v3633_v35 = vpop.f32.mrb[32].mxu1 }
 0x323   : > { %v1187_v36 = vmax.f32 %v1185_v11, %v3633_v35  ;;  %v3636_v37 = vpop.f32.mrb[33].mxu1 }
 0x324   : > { %4534 = vst [vmem:[#allocation7_spill] sm:$0xff] %v3636_v37  ;;  %v1224_v16 = vmax.f32 %v1222_v32, %v3636_v37  ;;  %v3639_v28 = vpop.f32.mrb[34].mxu1 }
 0x325   : > { %v1188_v20 = vmax.f32 %v1186_v33, %v3639_v28  ;;  %v3642_v45 = vpop.f32.mrb[35].mxu1 }
 0x326   : > { %4535 = vst [vmem:[#allocation8_spill] sm:$0xff] %v3642_v45  ;;  %v1225_v47 = vmax.f32 %v1223_v34, %v3642_v45 }
 0x32a   : > { %v3645_v49 = vpop.f32.mrb[36].mxu1 }
 0x32b   : > { %v1189_v51 = vmax.f32 %v1187_v36, %v3645_v49  ;;  %v3648_v53 = vpop.f32.mrb[37].mxu1 }
 0x32c   : > { %4536 = vst [vmem:[#allocation9_spill] sm:$0xff] %v3648_v53  ;;  %v1226_v55 = vmax.f32 %v1224_v16, %v3648_v53  ;;  %v3651_v57 = vpop.f32.mrb[38].mxu1 }
 0x32d   : > { %v1190_v59 = vmax.f32 %v1188_v20, %v3651_v57  ;;  %v3654_v61 = vpop.f32.mrb[39].mxu1 }
 0x32e   : > { %4537 = vst [vmem:[#allocation10_spill] sm:$0xff] %v3654_v61  ;;  %v1227_v63 = vmax.f32 %v1225_v47, %v3654_v61 }
 0x332   : > { %v3657_v1 = vpop.f32.mrb[40].mxu1 }
 0x333   : > { %v1191_v4 = vmax.f32 %v1189_v51, %v3657_v1  ;;  %v3660_v6 = vpop.f32.mrb[41].mxu1 }
 0x334   : > { %4538 = vst [vmem:[#allocation11_spill] sm:$0xff] %v3660_v6  ;;  %v1228_v8 = vmax.f32 %v1226_v55, %v3660_v6  ;;  %v3663_v14 = vpop.f32.mrb[42].mxu1 }
 0x335   : > { %v1192_v17 = vmax.f32 %v1190_v59, %v3663_v14  ;;  %v3666_v19 = vpop.f32.mrb[43].mxu1 }
 0x336   : > { %4539 = vst [vmem:[#allocation12_spill] sm:$0xff] %v3666_v19  ;;  %v1229_v22 = vmax.f32 %v1227_v63, %v3666_v19 }
 0x33a   : > { %v3669_v25 = vpop.f32.mrb[44].mxu1 }
 0x33b   : > { %v1193_v27 = vmax.f32 %v1191_v4, %v3669_v25  ;;  %v3672_v30 = vpop.f32.mrb[45].mxu1 }
 0x33c   : > { %4540 = vst [vmem:[#allocation13_spill] sm:$0xff] %v3672_v30  ;;  %v1230_v11 = vmax.f32 %v1228_v8, %v3672_v30  ;;  %v3675_v32 = vpop.f32.mrb[46].mxu1 }
 0x33d   : > { %v1194_v33 = vmax.f32 %v1192_v17, %v3675_v32  ;;  %v3678_v34 = vpop.f32.mrb[47].mxu1 }
 0x33e   : > { %4541 = vst [vmem:[#allocation14_spill] sm:$0xff] %v3678_v34  ;;  %v1231_v36 = vmax.f32 %v1229_v22, %v3678_v34 }
 0x342   : > { %v3681_v16 = vpop.f32.mrb[48].mxu1 }
 0x343   : > { %v1195_v20 = vmax.f32 %v1193_v27, %v3681_v16  ;;  %v3684_v47 = vpop.f32.mrb[49].mxu1 }
 0x344   : > { %4542 = vst [vmem:[#allocation15_spill] sm:$0xff] %v3684_v47  ;;  %v1232_v51 = vmax.f32 %v1230_v11, %v3684_v47  ;;  %v3687_v55 = vpop.f32.mrb[50].mxu1 }
 0x345   : > { %v1196_v59 = vmax.f32 %v1194_v33, %v3687_v55  ;;  %v3690_v63 = vpop.f32.mrb[51].mxu1 }
 0x346   : > { %4543 = vst [vmem:[#allocation16_spill] sm:$0xff] %v3690_v63  ;;  %v1233_v4 = vmax.f32 %v1231_v36, %v3690_v63 }
 0x34a   : > { %v3693_v8 = vpop.f32.mrb[52].mxu1 }
 0x34b   : > { %v1197_v17 = vmax.f32 %v1195_v20, %v3693_v8  ;;  %v3696_v22 = vpop.f32.mrb[53].mxu1 }
 0x34c   : > { %4544 = vst [vmem:[#allocation17_spill] sm:$0xff] %v3696_v22  ;;  %v1234_v27 = vmax.f32 %v1232_v51, %v3696_v22  ;;  %v3699_v2 = vpop.f32.mrb[54].mxu1 }
 0x34d   : > { %v1198_v11 = vmax.f32 %v1196_v59, %v3699_v2  ;;  %v3702_v47 = vpop.f32.mrb[55].mxu1 }
 0x34e   : > { %4545 = vst [vmem:[#allocation18_spill] sm:$0xff] %v3702_v47  ;;  %v1235_v33 = vmax.f32 %v1233_v4, %v3702_v47 }
 0x352   : > { %v3705_v34 = vpop.f32.mrb[56].mxu1 }
 0x353   : > { %v1199_v36 = vmax.f32 %v1197_v17, %v3705_v34  ;;  %v3708_v63 = vpop.f32.mrb[57].mxu1 }
 0x354   : > { %4546 = vst [vmem:[#allocation19_spill] sm:$0xff] %v3708_v63  ;;  %v1236_v20 = vmax.f32 %v1234_v27, %v3708_v63  ;;  %v3711_v30 = vpop.f32.mrb[58].mxu1 }
 0x355   : > { %v1200_v51 = vmax.f32 %v1198_v11, %v3711_v30  ;;  %v3714_v22 = vpop.f32.mrb[59].mxu1 }
 0x356   : > { %4547 = vst [vmem:[#allocation20_spill] sm:$0xff] %v3714_v22  ;;  %v1237_v59 = vmax.f32 %v1235_v33, %v3714_v22 }
 0x35a   : > { %v3717_v19 = vpop.f32.mrb[60].mxu1 }
 0x35b   : > { %v1201_v4 = vmax.f32 %v1199_v36, %v3717_v19  ;;  %v3720_v47 = vpop.f32.mrb[61].mxu1 }
 0x35c   : > { %4548 = vst [vmem:[#allocation21_spill] sm:$0xff] %v3720_v47  ;;  %v1238_v17 = vmax.f32 %v1236_v20, %v3720_v47  ;;  %v3723_v6 = vpop.f32.mrb[62].mxu1 }
 0x35d   : > { %v1202_v27 = vmax.f32 %v1200_v51, %v3723_v6  ;;  %v3726_v63 = vpop.f32.mrb[63].mxu1 }
 0x35e   : > { %4549 = vst [vmem:[#allocation22_spill] sm:$0xff] %v3726_v63  ;;  %v1239_v11 = vmax.f32 %v1237_v59, %v3726_v63 }
 0x35f   : > { %v1203_v61 = vmax.f32 %v1201_v4, %v1202_v27 }
 0x360   : > { %v1240_v53 = vmax.f32 %v1238_v17, %v1239_v11 }
 0x361   : > { %v1204_v45 = vrot.slane %v1203_v61, 4 }
 0x362   : > { %v1241_v33 = vrot.slane %v1240_v53, 4 }
 0x363   : > { %v1205_v22 = vmax.f32 %v1203_v61, %v1204_v45 }
 0x364   : > { %v1242_v37 = vmax.f32 %v1240_v53, %v1241_v33 }
 0x365   : > { %v1206_v12 = vrot.slane %v1205_v22, 2 }
 0x366   : > { %v1243_v36 = vrot.slane %v1242_v37, 2 }
 0x367   : > { %v1207_v31 = vmax.f32 %v1205_v22, %v1206_v12  ;;  %v3741_v12 = vpop.f32.mrb[16].mxu0 }
 0x368   : > { %v1244_v29 = vmax.f32 %v1242_v37, %v1243_v36  ;;  %4550 = vst [vmem:[#allocation23_spill] sm:$0xff] %v3741_v12 }
 0x369   : > { %v1208_v23 = vrot.slane %v1207_v31, 1 }
 0x36a   : > { %v1245_v20 = vrot.slane %v1244_v29, 1 }
 0x36b   : > { %v3729_v47 = vmax.f32 %v1207_v31, %v1208_v23  ;;  %v3751_v31 = vpop.f32.mrb[17].mxu0 }
 0x36c   : > { %v3731_v18 = vmax.f32 %v1244_v29, %v1245_v20  ;;  %v3761_v37 = vpop.f32.mrb[18].mxu0 }
 0x36d   : > { %v1247_v51 = vsub.f32 %v3537_v38, %v3729_v47  ;;  %v1249_v59 = vsub.f32 %v3541_v40, %v3729_v47  ;;  %v1251_v45 = vsub.f32 %v3545_v41, %v3729_v47  ;;  %v1253_v53 = vsub.f32 %v3553_v43, %v3729_v47  ;;  %v3771_v61 = vpop.f32.mrb[19].mxu0 }
 0x36e   : > { %v1255_v23 = vsub.f32 %v3561_v46, %v3729_v47  ;;  %v1257_v29 = vsub.f32 %v3567_v50, %v3729_v47  ;;  %v1259_v38 = vsub.f32 %v3573_v54, %v3729_v47  ;;  %v1261_v40 = vsub.f32 %v3579_v58, %v3729_v47  ;;  %v3781_v22 = vpop.f32.mrb[20].mxu0 }
 0x36f   : > { %v1263_v41 = vsub.f32 %v3585_v62, %v3729_v47  ;;  %v1265_v43 = vsub.f32 %v3591_v3, %v3729_v47  ;;  %v1267_v46 = vsub.f32 %v3597_v7, %v3729_v47  ;;  %v1269_v50 = vsub.f32 %v3603_v15, %v3729_v47  ;;  %4551 = vst [vmem:[#allocation24_spill] sm:$0xff] %v3781_v22  ;;  %v3791_v4 = vpop.f32.mrb[21].mxu0 }
 0x370   : > { %v1271_v54 = vsub.f32 %v3609_v21, %v3729_v47  ;;  %v1273_v58 = vsub.f32 %v3615_v26, %v3729_v47  ;;  %v1275_v62 = vsub.f32 %v3621_v9, %v3729_v47  ;;  %v1277_v3 = vsub.f32 %v3627_v10, %v3729_v47  ;;  %4552 = vst [vmem:[#allocation25_spill] sm:$0xff] %v3791_v4  ;;  %v3801_v17 = vpop.f32.mrb[22].mxu0 }
 0x371   : > { %v1279_v7 = vsub.f32 %v3633_v35, %v3729_v47  ;;  %v1281_v15 = vsub.f32 %v3639_v28, %v3729_v47  ;;  %v1283_v21 = vsub.f32 %v3645_v49, %v3729_v47  ;;  %v1285_v26 = vsub.f32 %v3651_v57, %v3729_v47  ;;  %4553 = vst [vmem:[#allocation26_spill] sm:$0xff] %v3801_v17  ;;  %v3811_v33 = vpop.f32.mrb[23].mxu0 }
 0x372   : > { %v1287_v9 = vsub.f32 %v3657_v1, %v3729_v47  ;;  %v1289_v10 = vsub.f32 %v3663_v14, %v3729_v47  ;;  %v1291_v35 = vsub.f32 %v3669_v25, %v3729_v47  ;;  %v1293_v28 = vsub.f32 %v3675_v32, %v3729_v47  ;;  %4554 = vst [vmem:[#allocation27_spill] sm:$0xff] %v3811_v33 }
 0x373   : > { %v1311_v36 = vmul.f32 1.442695, %v1247_v51  ;;  %v1315_v20 = vmul.f32 1.442695, %v1249_v59  ;;  %v1319_v1 = vmul.f32 1.442695, %v1251_v45 }
 0x374   : > { %v1323_v57 = vmul.f32 1.442695, %v1253_v53  ;;  %v1327_v32 = vmul.f32 1.442695, %v1255_v23  ;;  %v1331_v49 = vmul.f32 1.442695, %v1257_v29 }
 0x375   : > { %2970 = vpow2.f32 %v1311_v36  ;;  %v1335_v27 = vmul.f32 1.442695, %v1259_v38  ;;  %v1339_v11 = vmul.f32 1.442695, %v1261_v40  ;;  %v1343_v4 = vmul.f32 1.442695, %v1263_v41 }
 0x376   : > { %2972 = vpow2.f32 %v1315_v20  ;;  %v1347_v33 = vmul.f32 1.442695, %v1265_v43  ;;  %v1351_v51 = vmul.f32 1.442695, %v1267_v46  ;;  %v1355_v59 = vmul.f32 1.442695, %v1269_v50 }
 0x377   : > { %2974 = vpow2.f32 %v1319_v1  ;;  %v1359_v45 = vmul.f32 1.442695, %v1271_v54  ;;  %v1363_v14 = vmul.f32 1.442695, %v1273_v58  ;;  %v1367_v53 = vmul.f32 1.442695, %v1275_v62 }
 0x378   : > { %2976 = vpow2.f32 %v1323_v57  ;;  %v1371_v17 = vmul.f32 1.442695, %v1277_v3  ;;  %v1375_v25 = vmul.f32 1.442695, %v1279_v7  ;;  %v1379_v36 = vmul.f32 1.442695, %v1281_v15 }
 0x379   : > { %2978 = vpow2.f32 %v1327_v32  ;;  %v1383_v23 = vmul.f32 1.442695, %v1283_v21  ;;  %v1387_v29 = vmul.f32 1.442695, %v1285_v26  ;;  %v1391_v1 = vmul.f32 1.442695, %v1287_v9 }
 0x37a   : > { %2980 = vpow2.f32 %v1331_v49  ;;  %v3817_v38 = vmul.f32 1.442695, %v1289_v10  ;;  %v3819_v40 = vmul.f32 1.442695, %v1291_v35  ;;  %v3821_v41 = vmul.f32 1.442695, %v1293_v28 }
 0x37b   : > { %2982 = vpow2.f32 %v1335_v27  ;;  %v4555_v9 = vld [vmem:[#allocation2_spill] sm:$0xff]  ;;  %v4557_v57 = vld [vmem:[#allocation4_spill] sm:$0xff]  ;;  %v4562_v21 = vld [vmem:[#allocation9_spill] sm:$0xff] }
 0x37c   : > { %2984 = vpow2.f32 %v1339_v11  ;;  %v4558_v11 = vld [vmem:[#allocation5_spill] sm:$0xff]  ;;  %v4559_v20 = vld [vmem:[#allocation6_spill] sm:$0xff]  ;;  %v4561_v26 = vld [vmem:[#allocation8_spill] sm:$0xff] }
 0x37d   : > { %2986 = vpow2.f32 %v1343_v4  ;;  %v4556_v4 = vld [vmem:[#allocation3_spill] sm:$0xff]  ;;  %v4574_v43 = vld [vmem:[#allocation21_spill] sm:$0xff] }
 0x37e   : > { %2988 = vpow2.f32 %v1347_v33  ;;  %v4563_v33 = vld [vmem:[#allocation10_spill] sm:$0xff] }
 0x37f   : > { %v3831_v58 = vpop.eup %2970  ;;  %2990 = vpow2.f32 %v1351_v51  ;;  %v4568_v51 = vld [vmem:[#allocation15_spill] sm:$0xff] }
 0x380   : > { %v3839_v15 = vpop.eup %2972  ;;  %2992 = vpow2.f32 %v1355_v59  ;;  %v4560_v59 = vld [vmem:[#allocation7_spill] sm:$0xff] }
 0x381   : > { %v3847_v35 = vpop.eup %2974  ;;  %2994 = vpow2.f32 %v1359_v45  ;;  %v1439_v28 = vadd.f32 %v3839_v15, %v3831_v58  ;;  %v4573_v45 = vld [vmem:[#allocation20_spill] sm:$0xff] }
 0x382   : > { %v3855_v27 = vpop.eup %2976  ;;  %2996 = vpow2.f32 %v1363_v14  ;;  %v4571_v14 = vld [vmem:[#allocation18_spill] sm:$0xff] }
 0x383   : > { %v3863_v10 = vpop.eup %2978  ;;  %2998 = vpow2.f32 %v1367_v53  ;;  %v1440_v49 = vadd.f32 %v3847_v35, %v1439_v28 }
 0x384   : > { %v3870_v7 = vpop.eup %2980  ;;  %3000 = vpow2.f32 %v1371_v17 }
 0x385   : > { %v3878_v54 = vpop.eup %2982  ;;  %3002 = vpow2.f32 %v1375_v25  ;;  %v1441_v28 = vadd.f32 %v3855_v27, %v1440_v49 }
 0x386   : > { %v3885_v46 = vpop.eup %2984  ;;  %3004 = vpow2.f32 %v1379_v36 }
 0x387   : > { %v3893_v3 = vpop.eup %2986  ;;  %3006 = vpow2.f32 %v1383_v23  ;;  %v1442_v49 = vadd.f32 %v3863_v10, %v1441_v28  ;;  %v4575_v28 = vsub.f32 %v3681_v16, %v3729_v47 }
 0x388   : > { %v3900_v32 = vpop.eup %2988  ;;  %3008 = vpow2.f32 %v1387_v29  ;;  %v4576_v29 = vsub.f32 %v3687_v55, %v3729_v47 }
 0x389   : > { %v3908_v62 = vpop.eup %2990  ;;  %3010 = vpow2.f32 %v1391_v1  ;;  %v1407_v17 = vmul.f32 1.442695, %v4575_v28  ;;  %v1443_v36 = vadd.f32 %v3870_v7, %v1442_v49  ;;  %v4577_v1 = vsub.f32 %v3693_v8, %v3729_v47 }
 0x38a   : > { %v3914_v50 = vpop.eup %2992  ;;  %3012 = vpow2.f32 %v3817_v38  ;;  %v1411_v25 = vmul.f32 1.442695, %v4576_v29  ;;  %v4578_v38 = vsub.f32 %v3699_v2, %v3729_v47  ;;  %v4581_v2 = vsub.f32 %v3717_v19, %v3729_v47 }
 0x38b   : > { %v3920_v53 = vpop.eup %2994  ;;  %3014 = vpow2.f32 %v3819_v40  ;;  %v1415_v23 = vmul.f32 1.442695, %v4577_v1  ;;  %v1444_v16 = vadd.f32 %v3878_v54, %v1443_v36  ;;  %v4579_v40 = vsub.f32 %v3705_v34, %v3729_v47 }
 0x38c   : > { %v3927_v28 = vpop.eup %2996  ;;  %3016 = vpow2.f32 %v3821_v41  ;;  %v1419_v49 = vmul.f32 1.442695, %v4578_v38  ;;  %v4580_v36 = vsub.f32 %v3711_v30, %v3729_v47  ;;  %v4584_v19 = vsub.f32 %v3543_v24, %v3731_v18 }
 0x38d   : > { %v3933_v55 = vpop.eup %2998  ;;  %3018 = vpow2.f32 %v1407_v17  ;;  %v1423_v29 = vmul.f32 1.442695, %v4579_v40  ;;  %v1445_v8 = vadd.f32 %v3885_v46, %v1444_v16  ;;  %v1431_v17 = vmul.f32 1.442695, %v4581_v2 }
 0x38e   : > { %v3939_v1 = vpop.eup %3000  ;;  %3020 = vpow2.f32 %v1411_v25  ;;  %v1427_v41 = vmul.f32 1.442695, %v4580_v36  ;;  %v4582_v16 = vsub.f32 %v3723_v6, %v3729_v47  ;;  %v4585_v6 = vsub.f32 %v3549_v42, %v3731_v18 }
 0x38f   : > { %v3944_v63 = vpop.eup %3002  ;;  %3022 = vpow2.f32 %v1415_v23  ;;  %v1446_v38 = vadd.f32 %v3893_v3, %v1445_v8  ;;  %v4583_v23 = vsub.f32 %v3539_v39, %v3731_v18  ;;  %v1317_v8 = vmul.f32 1.442695, %v4584_v19 }
 0x390   : > { %v3950_v34 = vpop.eup %3004  ;;  %3024 = vpow2.f32 %v1419_v49  ;;  %v1435_v25 = vmul.f32 1.442695, %v4582_v16  ;;  %v1321_v47 = vmul.f32 1.442695, %v4585_v6  ;;  %v4586_v49 = vsub.f32 %v3557_v44, %v3731_v18 }
 0x391   : > { %v3955_v40 = vpop.eup %3006  ;;  %3026 = vpow2.f32 %v1423_v29  ;;  %v1447_v30 = vadd.f32 %v3900_v32, %v1446_v38  ;;  %v1313_v36 = vmul.f32 1.442695, %v4583_v23  ;;  %v4587_v38 = vsub.f32 %v3564_v48, %v3731_v18 }
 0x392   : > { %v3964_v2 = vpop.eup %3008  ;;  %3028 = vpow2.f32 %v1427_v41  ;;  %v1325_v29 = vmul.f32 1.442695, %v4586_v49  ;;  %v4588_v41 = vsub.f32 %v3570_v52, %v3731_v18  ;;  %v4589_v42 = vsub.f32 %v3576_v56, %v3731_v18 }
 0x393   : > { %v1329_v39 = vmul.f32 1.442695, %v4587_v38  ;;  %v3975_v16 = vpop.eup %3010  ;;  %3030 = vpow2.f32 %v1431_v17  ;;  %v1448_v24 = vadd.f32 %v3908_v62, %v1447_v30  ;;  %v4590_v44 = vsub.f32 %v3582_v60, %v3731_v18 }
 0x394   : > { %v1333_v23 = vmul.f32 1.442695, %v4588_v41  ;;  %v1337_v19 = vmul.f32 1.442695, %v4589_v42  ;;  %v3984_v6 = vpop.eup %3012  ;;  %3032 = vpow2.f32 %v1435_v25  ;;  %v4591_v17 = vsub.f32 %v3588_v0, %v3731_v18 }
 0x395   : > { %v1341_v48 = vmul.f32 1.442695, %v4590_v44  ;;  %v4592_v30 = vsub.f32 %v3594_v5, %v3731_v18  ;;  %v3995_v38 = vpop.eup %3014  ;;  %v1449_v56 = vadd.f32 %v3914_v50, %v1448_v24  ;;  %3034 = vpow2.f32 %v1313_v36  ;;  %v4596_v36 = vld [vmem:[#allocation25_spill] sm:$0xff]  ;;  %v4597_v5 = vld [vmem:[#allocation27_spill] sm:$0xff] }
 0x396   : > { %v1345_v49 = vmul.f32 1.442695, %v4591_v17  ;;  %v4593_v25 = vsub.f32 %v3600_v13, %v3731_v18  ;;  %v4594_v60 = vsub.f32 %v4555_v9, %v3731_v18  ;;  %v4004_v44 = vpop.eup %3016  ;;  %3036 = vpow2.f32 %v1317_v8 }
 0x397   : > { %v1349_v52 = vmul.f32 1.442695, %v4592_v30  ;;  %v4012_v24 = vpop.eup %3018  ;;  %v1450_v13 = vadd.f32 %v3920_v53, %v1449_v56  ;;  %3038 = vpow2.f32 %v1321_v47 }
 0x398   : > { %v1353_v41 = vmul.f32 1.442695, %v4593_v25  ;;  %v1357_v42 = vmul.f32 1.442695, %v4594_v60  ;;  %v4019_v17 = vpop.eup %3020  ;;  %3040 = vpow2.f32 %v1325_v29  ;;  %v929_v60 = vpack.c.bf16 %v3771_v61, %v3751_v31 }
 0x399   : > { %v4027_v56 = vpop.eup %3022  ;;  %v1451_v47 = vadd.f32 %v3927_v28, %v1450_v13  ;;  %3042 = vpow2.f32 %v1329_v39  ;;  %v4599_v31 = vsub.f32 %v4557_v57, %v3731_v18  ;;  %v4602_v57 = vsub.f32 %v4560_v59, %v3731_v18 }
 0x39a   : > { %v4034_v9 = vpop.eup %3024  ;;  %3044 = vpow2.f32 %v1333_v23  ;;  %v4598_v23 = vsub.f32 %v4556_v4, %v3731_v18  ;;  %1577 = vmatprep.mubr.bf16.mxu0 %v929_v60 }
 0x39b   : > { %v4042_v13 = vpop.eup %3026  ;;  %v1452_v39 = vadd.f32 %v3933_v55, %v1451_v47  ;;  %3046 = vpow2.f32 %v1337_v19  ;;  %v1365_v61 = vmul.f32 1.442695, %v4599_v31  ;;  %v1377_v60 = vmul.f32 1.442695, %v4602_v57 }
 0x39c   : > { %v4049_v8 = vpop.eup %3028  ;;  %3048 = vpow2.f32 %v1341_v48  ;;  %v1361_v29 = vmul.f32 1.442695, %v4598_v23 }
 0x39d   : > { %v4057_v47 = vpop.eup %3030  ;;  %v1453_v19 = vadd.f32 %v3939_v1, %v1452_v39  ;;  %3050 = vpow2.f32 %v1345_v49  ;;  %v4600_v49 = vsub.f32 %v4558_v11, %v3731_v18  ;;  %v4603_v39 = vsub.f32 %v4561_v26, %v3731_v18 }
 0x39e   : > { %v4065_v12 = vpop.eup %3032  ;;  %3052 = vpow2.f32 %v1349_v52  ;;  %v4601_v52 = vsub.f32 %v4559_v20, %v3731_v18  ;;  %v4604_v20 = vsub.f32 %v4562_v21, %v3731_v18  ;;  %v4608_v21 = vpack.c.bf16 %v3839_v15, %v3831_v58 }
 0x39f   : > { %v3035_v30 = vpop.eup %3034  ;;  %v1454_v0 = vadd.f32 %v3944_v63, %v1453_v19  ;;  %3054 = vpow2.f32 %v1353_v41  ;;  %v1369_v4 = vmul.f32 1.442695, %v4600_v49 }
 0x3a0   : > { %v3037_v23 = vpop.eup %3036  ;;  %3056 = vpow2.f32 %v1357_v42  ;;  %v1373_v48 = vmul.f32 1.442695, %v4601_v52  ;;  %v1381_v42 = vmul.f32 1.442695, %v4603_v39  ;;  %v1385_v52 = vmul.f32 1.442695, %v4604_v20 }
 0x3a1   : > { %v3039_v31 = vpop.eup %3038  ;;  %v1455_v41 = vadd.f32 %v3950_v34, %v1454_v0  ;;  %3058 = vpow2.f32 %v1361_v29  ;;  %v1476_v19 = vadd.f32 %v3037_v23, %v3035_v30  ;;  %v1514_v11 = vpack.c.bf16 %v3037_v23, %v3035_v30  ;;  %v4606_v23 = vld [vmem:[#allocation11_spill] sm:$0xff] }
 0x3a2   : > { %v3041_v49 = vpop.eup %3040  ;;  %3060 = vpow2.f32 %v1365_v61  ;;  %v4605_v30 = vsub.f32 %v4563_v33, %v3731_v18  ;;  %v4607_v26 = vsub.f32 %v4606_v23, %v3731_v18 }
 0x3a3   : > { %v3043_v22 = vpop.eup %3042  ;;  %v1456_v59 = vadd.f32 %v3955_v40, %v1455_v41  ;;  %3062 = vpow2.f32 %v1369_v4  ;;  %v1477_v57 = vadd.f32 %v3039_v31, %v1476_v19  ;;  %1545 = vmatprep.subr.bf16.mxu0 %v1514_v11  ;;  %v1516_v0 = vpack.c.bf16 %v3041_v49, %v3039_v31  ;;  %v4609_v19 = vld [vmem:[#allocation12_spill] sm:$0xff] }
 0x3a4   : > { %v3045_v29 = vpop.eup %3044  ;;  %3064 = vpow2.f32 %v1373_v48  ;;  %v1389_v61 = vmul.f32 1.442695, %v4605_v30  ;;  %v1393_v39 = vmul.f32 1.442695, %v4607_v26  ;;  %1546 = vmatpush1.bf16.msra.mxu0 %v4608_v21  ;;  %v4610_v33 = vsub.f32 %v4609_v19, %v3731_v18  ;;  %v4611_v30 = vld [vmem:[#allocation13_spill] sm:$0xff] }
 0x3a5   : > { %v3047_v20 = vpop.eup %3046  ;;  %v1457_v4 = vadd.f32 %v3964_v2, %v1456_v59  ;;  %3066 = vpow2.f32 %v1377_v60  ;;  %v1478_v41 = vadd.f32 %v3041_v49, %v1477_v57  ;;  %1547 = vmatprep.subr.bf16.mxu0 %v1516_v0  ;;  %v1518_v31 = vpack.c.bf16 %v3045_v29, %v3043_v22  ;;  %v4613_v49 = vld [vmem:[#allocation14_spill] sm:$0xff] }
 0x3a6   : > { %v3049_v48 = vpop.eup %3048  ;;  %3068 = vpow2.f32 %v1381_v42  ;;  %v1397_v11 = vmul.f32 1.442695, %v4610_v33  ;;  %v4612_v23 = vsub.f32 %v4611_v30, %v3731_v18  ;;  %v4614_v57 = vsub.f32 %v4613_v49, %v3731_v18  ;;  %v4619_v49 = vld [vmem:[#allocation17_spill] sm:$0xff] }
 0x3a7   : > { %v3051_v25 = vpop.eup %3050  ;;  %v1458_v58 = vadd.f32 %v3975_v16, %v1457_v4  ;;  %3070 = vpow2.f32 %v1385_v52  ;;  %v1479_v15 = vadd.f32 %v3043_v22, %v1478_v41  ;;  %v1520_v59 = vpack.c.bf16 %v3049_v48, %v3047_v20  ;;  %v4617_v41 = vld [vmem:[#allocation16_spill] sm:$0xff] }
 0x3a8   : > { %v1401_v26 = vmul.f32 1.442695, %v4612_v23  ;;  %v3053_v60 = vpop.eup %3052  ;;  %3072 = vpow2.f32 %v1389_v61  ;;  %v1405_v42 = vmul.f32 1.442695, %v4614_v57  ;;  %v4615_v0 = vsub.f32 %v4568_v51, %v3731_v18 }
 0x3a9   : > { %v4616_v19 = vpack.c.bf16 %v3855_v27, %v3847_v35  ;;  %v3055_v33 = vpop.eup %3054  ;;  %v1459_v4 = vadd.f32 %v3984_v6, %v1458_v58  ;;  %3074 = vpow2.f32 %v1393_v39  ;;  %v1480_v22 = vadd.f32 %v3045_v29, %v1479_v15 }
 0x3aa   : > { %v1409_v21 = vmul.f32 1.442695, %v4615_v0  ;;  %v1522_v52 = vpack.c.bf16 %v3053_v60, %v3051_v25  ;;  %v3057_v61 = vpop.eup %3056  ;;  %3076 = vpow2.f32 %v1397_v11  ;;  %v4618_v30 = vsub.f32 %v4617_v41, %v3731_v18  ;;  %v4622_v11 = vld [vmem:[#allocation19_spill] sm:$0xff] }
 0x3ab   : > { %1548 = vmatpush1.bf16.msra.mxu0 %v4616_v19  ;;  %v4620_v51 = vsub.f32 %v4619_v49, %v3731_v18  ;;  %v3059_v0 = vpop.eup %3058  ;;  %v1460_v35 = vadd.f32 %v3995_v38, %v1459_v4  ;;  %3078 = vpow2.f32 %v1401_v26  ;;  %v1481_v27 = vadd.f32 %v3047_v20, %v1480_v22 }
 0x3ac   : > { %1549 = vmatprep.subr.bf16.mxu0 %v1518_v31  ;;  %v1413_v23 = vmul.f32 1.442695, %v4618_v30  ;;  %v1524_v58 = vpack.c.bf16 %v3057_v61, %v3055_v33  ;;  %v3061_v39 = vpop.eup %3060  ;;  %3080 = vpow2.f32 %v1405_v42  ;;  %v4621_v29 = vsub.f32 %v4571_v14, %v3731_v18 }
 0x3ad   : > { %v1417_v57 = vmul.f32 1.442695, %v4620_v51  ;;  %v4623_v15 = vsub.f32 %v4622_v11, %v3731_v18  ;;  %v4624_v41 = vpack.c.bf16 %v3870_v7, %v3863_v10  ;;  %v3063_v30 = vpop.eup %3062  ;;  %v1461_v4 = vadd.f32 %v4004_v44, %v1460_v35 }
 0x3ae   : > { %v1421_v31 = vmul.f32 1.442695, %v4621_v29  ;;  %3082 = vpow2.f32 %v1409_v21  ;;  %v1482_v20 = vadd.f32 %v3049_v48, %v1481_v27  ;;  %v1526_v26 = vpack.c.bf16 %v3061_v39, %v3059_v0  ;;  %v3065_v42 = vpop.eup %3064  ;;  %v4627_v48 = vld [vmem:[#allocation22_spill] sm:$0xff] }
 0x3af   : > { %v1425_v19 = vmul.f32 1.442695, %v4623_v15  ;;  %1550 = vmatpush1.bf16.msra.mxu0 %v4624_v41  ;;  %3084 = vpow2.f32 %v1413_v23  ;;  %v4625_v14 = vsub.f32 %v4573_v45, %v3731_v18  ;;  %v4626_v49 = vsub.f32 %v4574_v43, %v3731_v18  ;;  %v3067_v29 = vpop.eup %3066 }
 0x3b0   : > { %1551 = vmatprep.subr.bf16.mxu0 %v1520_v59  ;;  %v1462_v7 = vadd.f32 %v4012_v24, %v1461_v4  ;;  %3086 = vpow2.f32 %v1417_v57  ;;  %v1483_v10 = vadd.f32 %v3051_v25, %v1482_v20  ;;  %v1528_v35 = vpack.c.bf16 %v3065_v42, %v3063_v30  ;;  %v3069_v21 = vpop.eup %3068 }
 0x3b1   : > { %v1429_v22 = vmul.f32 1.442695, %v4625_v14  ;;  %v1433_v51 = vmul.f32 1.442695, %v4626_v49  ;;  %3088 = vpow2.f32 %v1421_v31  ;;  %v4628_v59 = vsub.f32 %v4627_v48, %v3731_v18  ;;  %v3071_v27 = vpop.eup %3070 }
 0x3b2   : > { %v4629_v45 = vpack.c.bf16 %v3885_v46, %v3878_v54  ;;  %v1463_v43 = vadd.f32 %v4019_v17, %v1462_v7  ;;  %3090 = vpow2.f32 %v1425_v19  ;;  %v1484_v11 = vadd.f32 %v3053_v60, %v1483_v10  ;;  %v3073_v57 = vpop.eup %3072 }
 0x3b3   : > { %v1437_v23 = vmul.f32 1.442695, %v4628_v59  ;;  %v1530_v15 = vpack.c.bf16 %v3069_v21, %v3067_v29  ;;  %3092 = vpow2.f32 %v1429_v22  ;;  %v3075_v25 = vpop.eup %3074  ;;  %v1532_v18 = vpack.c.bf16 %v3073_v57, %v3071_v27 }
 0x3b4   : > { %1552 = vmatpush1.bf16.msra.mxu0 %v4629_v45  ;;  %v1464_v31 = vadd.f32 %v4027_v56, %v1463_v43  ;;  %3094 = vpow2.f32 %v1433_v51  ;;  %v1485_v41 = vadd.f32 %v3055_v33, %v1484_v11  ;;  %v3077_v4 = vpop.eup %3076  ;;  %v4630_v46 = vpack.c.bf16 %v3900_v32, %v3893_v3 }
 0x3b5   : > { %1553 = vmatprep.subr.bf16.mxu0 %v1522_v52  ;;  %3096 = vpow2.f32 %v1437_v23  ;;  %v3079_v54 = vpop.eup %3078  ;;  %v1534_v52 = vpack.c.bf16 %v3077_v4, %v3075_v25  ;;  %v4631_v7 = vpack.c.bf16 %v3914_v50, %v3908_v62 }
 0x3b6   : > { %v1465_v19 = vadd.f32 %v4034_v9, %v1464_v31  ;;  %v1486_v60 = vadd.f32 %v3057_v61, %v1485_v41  ;;  %v3081_v20 = vpop.eup %3080 }
 0x3b7   : > { %v1536_v51 = vpack.c.bf16 %v3081_v20, %v3079_v54 }
 0x3b8   : > { %1554 = vmatpush1.bf16.msra.mxu0 %v4630_v46  ;;  %v3083_v14 = vpop.eup %3082  ;;  %v1466_v22 = vadd.f32 %v4042_v13, %v1465_v19  ;;  %v1487_v49 = vadd.f32 %v3059_v0, %v1486_v60  ;;  %v4632_v0 = vpack.c.bf16 %v3927_v28, %v3920_v53  ;;  %v4633_v46 = vpack.c.bf16 %v3939_v1, %v3933_v55 }
 0x3b9   : > { %1555 = vmatprep.subr.bf16.mxu0 %v1524_v58  ;;  %v3085_v33 = vpop.eup %3084  ;;  %v4634_v53 = vpack.c.bf16 %v3950_v34, %v3944_v63  ;;  %v4636_v55 = vpack.c.bf16 %v3984_v6, %v3975_v16  ;;  %v4637_v63 = vpack.c.bf16 %v4004_v44, %v3995_v38  ;;  %v4639_v16 = vpack.c.bf16 %v4034_v9, %v4027_v56  ;;  %v4645_v56 = vld [vmem:[#allocation26_spill] sm:$0xff] }
 0x3ba   : > { %v3087_v10 = vpop.eup %3086  ;;  %v1467_v3 = vadd.f32 %v4049_v8, %v1466_v22  ;;  %v1488_v32 = vadd.f32 %v3061_v39, %v1487_v49  ;;  %v1538_v48 = vpack.c.bf16 %v3085_v33, %v3083_v14  ;;  %v4640_v38 = vpack.c.bf16 %v4049_v8, %v4042_v13 }
 0x3bb   : > { %v3089_v61 = vpop.eup %3088  ;;  %v4644_v9 = vpack.c.bf16 %v4597_v5, %v4596_v36  ;;  %v4648_v8 = vmov 0  }
 0x3bc   : > { %1556 = vmatpush1.bf16.msra.mxu0 %v4631_v7  ;;  %v3091_v58 = vpop.eup %3090  ;;  %v1468_v59 = vadd.f32 %v4057_v47, %v1467_v3  ;;  %v1489_v23 = vadd.f32 %v3063_v30, %v1488_v32  ;;  %v1540_v45 = vpack.c.bf16 %v3089_v61, %v3087_v10 }
 0x3bd   : > { %1557 = vmatprep.subr.bf16.mxu0 %v1526_v26  ;;  %v3093_v43 = vpop.eup %3092 }
 0x3be   : > { %v3095_v11 = vpop.eup %3094  ;;  %v1469_v50 = vadd.f32 %v4065_v12, %v1468_v59  ;;  %v1490_v62 = vadd.f32 %v3065_v42, %v1489_v23  ;;  %v1542_v31 = vpack.c.bf16 %v3093_v43, %v3091_v58  ;;  %v4635_v42 = vpack.c.bf16 %v3964_v2, %v3955_v40  ;;  %v3166_v23 = vld [vmem:[%s3322_s30 + $0x10] sm:$0xff] }
 0x3bf   : > { %v3097_v39 = vpop.eup %3096  ;;  %v4638_v40 = vpack.c.bf16 %v4019_v17, %v4012_v24  ;;  %v4641_v24 = vpack.c.bf16 %v4065_v12, %v4057_v47  ;;  %v4642_v17 = vld [vmem:[#allocation23_spill] sm:$0xff] }
 0x3c0   : > { %1558 = vmatpush1.bf16.msra.mxu0 %v4632_v0  ;;  %v1491_v26 = vadd.f32 %v3067_v29, %v1490_v62  ;;  %v1544_v41 = vpack.c.bf16 %v3097_v39, %v3095_v11  ;;  %v1470_v13 = vrot.slane %v1469_v50, 4  ;;  %v3169_v62 = vld [vmem:[%s3322_s30 + $0x8] sm:$0xff] }
 0x3c1   : > { %1559 = vmatprep.subr.bf16.mxu0 %v1528_v35 }
 0x3c2   : > { %v1492_v30 = vadd.f32 %v3069_v21, %v1491_v26 }
 0x3c4   : > { %1560 = vmatpush1.bf16.msra.mxu0 %v4633_v46  ;;  %v1493_v19 = vadd.f32 %v3071_v27, %v1492_v30 }
 0x3c5   : > { %1561 = vmatprep.subr.bf16.mxu0 %v1530_v15 }
 0x3c6   : > { %v1494_v28 = vadd.f32 %v3073_v57, %v1493_v19 }
 0x3c8   : > { %1562 = vmatpush1.bf16.msra.mxu0 %v4634_v53  ;;  %v1495_v60 = vadd.f32 %v3075_v25, %v1494_v28  ;;  %v4643_v25 = vpack.c.bf16 %v3761_v37, %v4642_v17 }
 0x3c9   : > { %1563 = vmatprep.subr.bf16.mxu0 %v1532_v18  ;;  %v4646_v18 = vld [vmem:[#allocation24_spill] sm:$0xff] }
 0x3ca   : > { %v1496_v29 = vadd.f32 %v3077_v4, %v1495_v60  ;;  %v4647_v4 = vpack.c.bf16 %v4645_v56, %v4646_v18 }
 0x3cc   : > { %1564 = vmatpush1.bf16.msra.mxu0 %v4635_v42  ;;  %v1497_v35 = vadd.f32 %v3079_v54, %v1496_v29  ;;  %v3170_v42 = vld [vmem:[%s3322_s30 + $0x20] sm:$0xff] }
 0x3cd   : > { %1565 = vmatprep.subr.bf16.mxu0 %v1534_v52  ;;  %v1471_v52 = vadd.f32 %v1470_v13, %v1469_v50 }
 0x3ce   : > { %v1498_v1 = vadd.f32 %v3081_v20, %v1497_v35 }
 0x3cf   : > { %v1472_v12 = vrot.slane %v1471_v52, 2 }
 0x3d0   : > { %1566 = vmatpush1.bf16.msra.mxu0 %v4636_v55  ;;  %v1499_v21 = vadd.f32 %v3083_v14, %v1498_v1 }
 0x3d1   : > { %1567 = vmatprep.subr.bf16.mxu0 %v1536_v51  ;;  %v1473_v14 = vadd.f32 %v1472_v12, %v1471_v52 }
 0x3d2   : > { %v1500_v34 = vadd.f32 %v3085_v33, %v1499_v21 }
 0x3d3   : > { %v1474_v37 = vrot.slane %v1473_v14, 1 }
 0x3d4   : > { %1568 = vmatpush1.bf16.msra.mxu0 %v4637_v63  ;;  %v1501_v27 = vadd.f32 %v3087_v10, %v1500_v34  ;;  %v3171_v63 = vld [vmem:[%s3322_s30 + $0x28] sm:$0xff] }
 0x3d5   : > { %1569 = vmatprep.subr.bf16.mxu0 %v1538_v48  ;;  %v1475_v51 = vadd.f32 %v1474_v37, %v1473_v14 }
 0x3d6   : > { %v1502_v2 = vadd.f32 %v3089_v61, %v1501_v27 }
 0x3d7   : > { %3098 = vrcp.f32 %v1475_v51 }
 0x3d8   : > { %1570 = vmatpush1.bf16.msra.mxu0 %v4638_v40  ;;  %v1503_v15 = vadd.f32 %v3091_v58, %v1502_v2 }
 0x3d9   : > { %1571 = vmatprep.subr.bf16.mxu0 %v1540_v45 }
 0x3da   : > { %v1504_v6 = vadd.f32 %v3093_v43, %v1503_v15  ;;  %v3167_v43 = vld [vmem:[%s3322_s30 + $0x18] sm:$0xff] }
 0x3dc   : > { %1572 = vmatpush1.bf16.msra.mxu0 %v4639_v16  ;;  %v1505_v57 = vadd.f32 %v3095_v11, %v1504_v6  ;;  %v3168_v11 = vld [vmem:[%s3322_s30] sm:$0xff]  ;;  %v3172_v16 = vld [vmem:[%s3322_s30 + $0x30] sm:$0xff] }
 0x3dd   : > { %1573 = vmatprep.subr.bf16.mxu0 %v1542_v31 }
 0x3de   : > { %v1506_v44 = vadd.f32 %v3097_v39, %v1505_v57 }
 0x3e0   : > { %1574 = vmatpush1.bf16.msra.mxu0 %v4640_v38  ;;  %v1507_v54 = vrot.slane %v1506_v44, 4 }
 0x3e1   : > { %1575 = vmatprep.subr.bf16.mxu0 %v1544_v41  ;;  %v3099_v36 = vpop.eup %3098 }
 0x3e2   : > { %v1508_v20 = vadd.f32 %v1507_v54, %v1506_v44 }
 0x3e4   : > { %1576 = vmatpush1.bf16.msra.mxu0 %v4641_v24  ;;  %v1509_v47 = vrot.slane %v1508_v20, 2  ;;  %v3173_v24 = vld [vmem:[%s3322_s30 + $0x38] sm:$0xff] }
 0x3e6   : > { %v1510_v22 = vadd.f32 %v1509_v47, %v1508_v20 }
 0x3e7   : > { %1578 = vmatmul.mubr.bf16.vlgmr.msra.gmra.mrb[24].mxu0 %v4643_v25 }
 0x3e8   : > { %1587 = vmatprep.mubr.bf16.mxu0 %v4644_v9  ;;  %v1511_v49 = vrot.slane %v1510_v22, 1 }
 0x3ea   : > { %v1512_v5 = vadd.f32 %v1511_v49, %v1510_v22 }
 0x3ec   : > { %3100 = vrcp.f32 %v1512_v5 }
 0x3ef   : > { %1588 = vmatmul.mubr.bf16.gmra.mrb[28].mxu0 %v4647_v4 }
 0x3f0   : > { %1808 = vmatprep.mubr.bf16.mxu0 %v4648_v8 }
 0x3f6   : > { %v3101_v7 = vpop.eup %3100 }
 0x4ba   : > { %v1579_v33 = vpop.f32.mrb[24].mxu0 }
 0x4bb   : > { %v1600_v10 = vmul.f32 %v3099_v36, %v1579_v33  ;;  %v1581_v3 = vpop.f32.mrb[25].mxu0 }
 0x4bc   : > { %v1601_v32 = vmul.f32 %v3101_v7, %v1581_v3  ;;  %v1583_v48 = vpop.f32.mrb[26].mxu0 }
 0x4bd   : > { %v1602_v61 = vmul.f32 %v3099_v36, %v1583_v48  ;;  %v1585_v58 = vpop.f32.mrb[27].mxu0  ;;  %v4207_v50 = vadd.f32 %v3168_v11, %v1600_v10 }
 0x4be   : > { %v1603_v59 = vmul.f32 %v3101_v7, %v1585_v58  ;;  %v4210_v31 = vadd.f32 %v3169_v62, %v1601_v32 }
 0x4bf   : > { %v4201_v45 = vadd.f32 %v3166_v23, %v1602_v61  ;;  %v1636_v28 = vmul.f32 %v4207_v50, %v4207_v50 }
 0x4c0   : > { %v4204_v0 = vadd.f32 %v3167_v43, %v1603_v59  ;;  %v1637_v1 = vmul.f32 %v4210_v31, %v4210_v31 }
 0x4c1   : > { %v1638_v26 = vmul.f32 %v4201_v45, %v4201_v45  ;;  %v1616_v60 = vadd.f32 %v4201_v45, %v4207_v50 }
 0x4c2   : > { %v1589_v39 = vpop.f32.mrb[28].mxu0  ;;  %v1639_v30 = vmul.f32 %v4204_v0, %v4204_v0  ;;  %v1625_v21 = vadd.f32 %v4204_v0, %v4210_v31 }
 0x4c3   : > { %v1604_v41 = vmul.f32 %v3099_v36, %v1589_v39  ;;  %v1591_v46 = vpop.f32.mrb[29].mxu0  ;;  %v1644_v40 = vadd.f32 %v1638_v26, %v1636_v28 }
 0x4c4   : > { %v1605_v19 = vmul.f32 %v3101_v7, %v1591_v46  ;;  %v1593_v53 = vpop.f32.mrb[30].mxu0  ;;  %v1653_v57 = vadd.f32 %v1639_v30, %v1637_v1 }
 0x4c5   : > { %v4221_v29 = vadd.f32 %v3170_v42, %v1604_v41  ;;  %v1606_v35 = vmul.f32 %v3099_v36, %v1593_v53  ;;  %v1595_v55 = vpop.f32.mrb[31].mxu0  ;;  %v1695_v42 = vpop.permute.xlu0 %1694 }
 0x4c6   : > { %v4228_v34 = vadd.f32 %v3171_v63, %v1605_v19  ;;  %v1607_v27 = vmul.f32 %v3101_v7, %v1595_v55 }
 0x4c7   : > { %v1617_v2 = vadd.f32 %v1616_v60, %v4221_v29  ;;  %v1640_v15 = vmul.f32 %v4221_v29, %v4221_v29  ;;  %v4234_v6 = vadd.f32 %v3172_v16, %v1606_v35  ;;  %v1700_v60 = vpop.permute.xlu1 %1699 }
 0x4c8   : > { %v1626_v38 = vadd.f32 %v1625_v21, %v4228_v34  ;;  %v1641_v44 = vmul.f32 %v4228_v34, %v4228_v34  ;;  %v4240_v17 = vadd.f32 %v3173_v24, %v1607_v27 }
 0x4c9   : > { %v1645_v25 = vadd.f32 %v1644_v40, %v1640_v15  ;;  %v1618_v9 = vadd.f32 %v1617_v2, %v4234_v6  ;;  %v1642_v56 = vmul.f32 %v4234_v6, %v4234_v6  ;;  %v1727_v63 = vpop.permute.xlu0 %1726 }
 0x4ca   : > { %v1654_v18 = vadd.f32 %v1653_v57, %v1641_v44  ;;  %v1627_v4 = vadd.f32 %v1626_v38, %v4240_v17  ;;  %v1643_v13 = vmul.f32 %v4240_v17, %v4240_v17 }
 0x4cb   : > { %v1619_v54 = vrot.slane %v1618_v9, 4  ;;  %v1646_v52 = vadd.f32 %v1645_v25, %v1642_v56  ;;  %v1732_v21 = vpop.permute.xlu1 %1731 }
 0x4cc   : > { %v1628_v20 = vrot.slane %v1627_v4, 4  ;;  %v1655_v12 = vadd.f32 %v1654_v18, %v1643_v13 }
 0x4cd   : > { %v1620_v47 = vadd.f32 %v1619_v54, %v1618_v9  ;;  %v1647_v14 = vrot.slane %v1646_v52, 4  ;;  %v1705_v40 = vpop.permute.xlu0 %1704 }
 0x4ce   : > { %v1629_v22 = vadd.f32 %v1628_v20, %v1627_v4  ;;  %v1656_v37 = vrot.slane %v1655_v12, 4 }
 0x4cf   : > { %v1621_v49 = vrot.slane %v1620_v47, 2  ;;  %v1648_v51 = vadd.f32 %v1647_v14, %v1646_v52  ;;  %v1710_v27 = vpop.permute.xlu1 %1709 }
 0x4d0   : > { %v1630_v5 = vrot.slane %v1629_v22, 2  ;;  %v1657_v36 = vadd.f32 %v1656_v37, %v1655_v12 }
 0x4d1   : > { %v1622_v33 = vadd.f32 %v1621_v49, %v1620_v47  ;;  %v1649_v7 = vrot.slane %v1648_v51, 2 }
 0x4d2   : > { %v1631_v10 = vadd.f32 %v1630_v5, %v1629_v22  ;;  %v1658_v3 = vrot.slane %v1657_v36, 2 }
 0x4d3   : > { %v1623_v32 = vrot.slane %v1622_v33, 1  ;;  %v1650_v48 = vadd.f32 %v1649_v7, %v1648_v51 }
 0x4d4   : > { %v1632_v61 = vrot.slane %v1631_v10, 1  ;;  %v1659_v58 = vadd.f32 %v1658_v3, %v1657_v36  ;;  %v1742_v36 = vpop.permute.xlu1 %1741 }
 0x4d5   : > { %v1624_v59 = vadd.f32 %v1623_v32, %v1622_v33  ;;  %v1651_v23 = vrot.slane %v1650_v48, 1  ;;  %v1737_v33 = vpop.permute.xlu0 %1736 }
 0x4d6   : > { %v1633_v43 = vadd.f32 %v1632_v61, %v1631_v10  ;;  %v1660_v11 = vrot.slane %v1659_v58, 1 }
 0x4d7   : > { %v1634_v62 = vmul.f32 0.03125, %v1624_v59  ;;  %v1652_v39 = vadd.f32 %v1651_v23, %v1650_v48 }
 0x4d8   : > { %v1635_v26 = vmul.f32 0.03125, %v1633_v43  ;;  %v1661_v41 = vadd.f32 %v1660_v11, %v1659_v58 }
 0x4d9   : > { %v1662_v46 = vmul.f32 0.03125, %v1652_v39  ;;  %v1664_v30 = vmul.f32 %v1634_v62, %v1634_v62  ;;  %v1674_v2 = vsub.f32 %v4234_v6, %v1634_v62  ;;  %v1668_v15 = vsub.f32 %v4207_v50, %v1634_v62 }
 0x4da   : > { %v1663_v19 = vmul.f32 0.03125, %v1661_v41  ;;  %v1665_v53 = vmul.f32 %v1635_v26, %v1635_v26  ;;  %v1670_v16 = vsub.f32 %v4201_v45, %v1634_v62  ;;  %v1672_v57 = vsub.f32 %v4221_v29, %v1634_v62  ;;  %v2950_v41 = vld [vmem:[%s4469_s7] sm:$0xff]  }
 0x4db   : > { %v1666_v28 = vsub.f32 %v1662_v46, %v1664_v30  ;;  %v1675_v44 = vsub.f32 %v4240_v17, %v1635_v26  ;;  %v1669_v24 = vsub.f32 %v4210_v31, %v1635_v26  ;;  %v1671_v25 = vsub.f32 %v4204_v0, %v1635_v26  ;;  %v2951_v46 = vld [vmem:[%s4470_s8] sm:$0xff]  }
 0x4dc   : > { %v1667_v35 = vsub.f32 %v1663_v19, %v1665_v53  ;;  %v1673_v9 = vsub.f32 %v4228_v34, %v1635_v26  ;;  %v3191_v30 = vmov 0.0   ;;  %v2952_v19 = vld [vmem:[%s4470_s8 + $0x8] sm:$0xff]  }
 0x4dd   : > { %v1676_v55 = vadd.f32 1e-05, %v1666_v28  ;;  %v2953_v53 = vld [vmem:[%s4469_s7 + $0x8] sm:$0xff]   ;;  %v2954_v28 = vld [vmem:[%s4470_s8 + $0x10] sm:$0xff]  }
 0x4de   : > { %v1677_v1 = vadd.f32 1e-05, %v1667_v35 }
 0x4df   : > { %3102 = vrsqrt.f32 %v1676_v55 }
 0x4e0   : > { %3104 = vrsqrt.f32 %v1677_v1  ;;  %v2956_v1 = vld [vmem:[%s4471_s9] sm:$0xff]  }
 0x4e9   : > { %v3103_v38 = vpop.eup %3102 }
 0x4ea   : > { %v3105_v56 = vpop.eup %3104  ;;  %v1686_v18 = vmul.f32 %v3103_v38, %v1674_v2  ;;  %v1680_v4 = vmul.f32 %v3103_v38, %v1668_v15  ;;  %v1682_v13 = vmul.f32 %v3103_v38, %v1670_v16  ;;  %v1684_v54 = vmul.f32 %v3103_v38, %v1672_v57 }
 0x4eb   : > { %v1681_v52 = vmul.f32 %v3105_v56, %v1669_v24  ;;  %v1683_v20 = vmul.f32 %v3105_v56, %v1671_v25  ;;  %v1685_v12 = vmul.f32 %v3105_v56, %v1673_v9  ;;  %v1687_v47 = vmul.f32 %v3105_v56, %v1675_v44 }
 0x4ec   : > { %v1712_v14 = vmul.f32 %v1695_v42, %v1680_v4  ;;  %v1714_v22 = vmul.f32 %v1700_v60, %v1682_v13  ;;  %v1716_v3 = vmul.f32 %v1705_v40, %v1684_v54  ;;  %v1718_v32 = vmul.f32 %v1710_v27, %v1686_v18 }
 0x4ed   : > { %v1713_v37 = vmul.f32 %v1695_v42, %v1681_v52  ;;  %v1715_v49 = vmul.f32 %v1700_v60, %v1683_v20  ;;  %v1717_v51 = vmul.f32 %v1705_v40, %v1685_v12  ;;  %v1719_v5 = vmul.f32 %v1710_v27, %v1687_v47  ;;  %v2955_v60 = vld [vmem:[%s4470_s8 + $0x18] sm:$0xff]   ;;  %v548_v42 = vld [vmem:[%s533_s17] sm:$0xff] }
 0x4ee   : > { %v1744_v7 = vadd.f32 %v1727_v63, %v1712_v14  ;;  %v1746_v10 = vadd.f32 %v1732_v21, %v1714_v22  ;;  %v1748_v11 = vadd.f32 %v1737_v33, %v1716_v3  ;;  %v1750_v62 = vadd.f32 %v1742_v36, %v1718_v32 }
 0x4ef   : > { %v1745_v48 = vadd.f32 %v1727_v63, %v1713_v37  ;;  %v1747_v61 = vadd.f32 %v1732_v21, %v1715_v49  ;;  %v1749_v58 = vadd.f32 %v1737_v33, %v1717_v51  ;;  %v1751_v59 = vadd.f32 %v1742_v36, %v1719_v5  ;;  %v2957_v21 = vld [vmem:[%s4471_s9 + $0x8] sm:$0xff]  }
 0x4f0   : > { %v1752_v43 = vpack.c.bf16 %v1746_v10, %v1744_v7  ;;  %v1754_v26 = vpack.c.bf16 %v1750_v62, %v1748_v11  ;;  %v1833_v35 = vpack.c.bf16 %v548_v42, %v548_v42 }
 0x4f1   : > { %v1753_v23 = vpack.c.bf16 %v1747_v61, %v1745_v48  ;;  %v1755_v39 = vpack.c.bf16 %v1751_v59, %v1749_v58 }
 0x4f2   : > { %v1868_v55 = vsel %vm1866_vm2, %v1833_v35, 0 }
 0x4f3   : > { %1776 = vmatprep.subr.bf16.mxu0 %v1753_v23 }
 0x4f4   : > { %1777 = vmatpush1.bf16.msra.mxu0 %v1752_v43 }
 0x4f5   : > { %1778 = vmatprep.subr.bf16.mxu0 %v1755_v39 }
 0x4f8   : > { %1779 = vmatpush1.bf16.msra.mxu0 %v1754_v26 }
 0x4f9   : > { %2912 = vmatprep.subr.bf16.mxu0 %v3191_v30 }
 0x4fb   : > { %2869 = vmatmul.mubr.msk.bf16.vlgmr.msra.gmra.mrb[32].mxu0 %vm732_vm0, %v2950_v41 }
 0x4fc   : > { %2913 = vmatpush3.bf16.msra.mxu0 %v2951_v46  ;;  %1818 = vmatprep.mubr.bf16.mxu0 %v4648_v8 }
 0x4fd   : > { %2914 = vmatprep.subr.bf16.mxu0 %v3191_v30 }
 0x500   : > { %2915 = vmatpush3.bf16.msra.mxu0 %v2952_v19 }
 0x501   : > { %2916 = vmatprep.subr.bf16.mxu0 %v3191_v30 }
 0x503   : > { %2870 = vmatmul.mubr.msk.bf16.gmra.mrb[36].mxu0 %vm732_vm0, %v2953_v53 }
 0x504   : > { %2917 = vmatpush3.bf16.msra.mxu0 %v2954_v28  ;;  %2920 = vmatprep.mubr.msk.bf16.mxu0 %vm3192_vm1, %v3191_v30 }
 0x505   : > { %2918 = vmatprep.subr.bf16.mxu0 %v3191_v30 }
 0x508   : > { %2919 = vmatpush3.bf16.msra.mxu0 %v2955_v60 }
 0x509   : > { %2930 = vmatprep.subr.msk.bf16.mxu0 %vm1866_vm2, %v1833_v35 }
 0x50b   : > { %2921 = vmatmul.mubr.msk.bf16.vlgmr.msra.gmra.mrb[40].mxu0 %vm1866_vm2, %v1833_v35 }
 0x50c   : > { %2926 = vmatprep.mubr.msk.bf16.mxu0 %vm1866_vm2, %v2956_v1 }
 0x511   : > { %2925 = vmatpush3.bf16.xpose.msra.mxu0 %v1868_v55 }
 0x518   : > { %2927 = vmatmul.mubr.msk.bf16.vlgmr.msra.gmra.mrb[44].mxu0 %vm1866_vm2, %v2957_v21 }
 0x519   : > { %2017 = vmatprep.mubr.bf16.mxu0 %v4648_v8 }
 0x5ce   : > { %v1810_v63 = vpop.f32.mrb[32].mxu0 }
 0x5cf   : > { %v1812_v27 = vpop.f32.mrb[33].mxu0 }
 0x5d0   : > { %v1814_v40 = vpop.f32.mrb[34].mxu0 }
 0x5d1   : > { %v1829_v2 = vpack.c.bf16 %v1814_v40, %v1810_v63  ;;  %v1816_v15 = vpop.f32.mrb[35].mxu0 }
 0x5d2   : > { %v1830_v16 = vpack.c.bf16 %v1816_v15, %v1812_v27 }
 0x5d4   : > { %1985 = vmatprep.subr.bf16.mxu0 %v1830_v16 }
 0x5d5   : > { %1986 = vmatpush1.bf16.msra.mxu0 %v1829_v2 }
 0x5d6   : > { %v1820_v57 = vpop.f32.mrb[36].mxu0 }
 0x5d7   : > { %v1822_v38 = vpop.f32.mrb[37].mxu0 }
 0x5d8   : > { %v1824_v44 = vpop.f32.mrb[38].mxu0 }
 0x5d9   : > { %v1831_v24 = vpack.c.bf16 %v1824_v44, %v1820_v57  ;;  %v1826_v25 = vpop.f32.mrb[39].mxu0 }
 0x5da   : > { %v1832_v9 = vpack.c.bf16 %v1826_v25, %v1822_v38 }
 0x5dc   : > { %1987 = vmatprep.subr.bf16.mxu0 %v1832_v9 }
 0x5dd   : > { %1988 = vmatpush1.bf16.msra.mxu0 %v1831_v24 }
 0x5de   : > { %v1904_v56 = vpop.f32.mrb[40].mxu0 }
 0x5df   : > { %v1910_v18 = vpack.c.bf16 %v1904_v56, %v1904_v56  ;;  %v2922_v4 = vpop.f32.mrb[41].mxu0 }
 0x5e0   : > { %v1907_v13 = vpop.f32.mrb[42].mxu0 }
 0x5e1   : > { %v2923_v54 = vpop.f32.mrb[43].mxu0  ;;  %2880 = vmatmul.mubr.msk.bf16.vlgmr.msra.gmra.mrb[48].mxu0 %vm732_vm0, %v1910_v18 }
 0x5e2   : > { %2104 = vmatprep.mubr.bf16.mxu0 %v4648_v8 }
 0x5eb   : > { %v2928_v52 = vpop.f32.mrb[44].mxu0 }
 0x5ec   : > { %v1965_v20 = vpop.f32.mrb[45].mxu0 }
 0x5ed   : > { %v2929_v12 = vpop.f32.mrb[46].mxu0 }
 0x5ee   : > { %v1981_v47 = vpack.c.bf16 %v2929_v12, %v2928_v52  ;;  %v1968_v14 = vpop.f32.mrb[47].mxu0 }
 0x5ef   : > { %v1980_v22 = vpack.c.bf16 %v1968_v14, %v1965_v20 }
 0x6b4   : > { %v2019_v37 = vpop.f32.mrb[48].mxu0 }
 0x6b5   : > { %v2026_v49 = vrot.slane %v2019_v37, 4  ;;  %v2021_v51 = vpop.f32.mrb[49].mxu0 }
 0x6b6   : > { %v2032_v5 = vrot.slane %v2021_v51, 4  ;;  %v2023_v36 = vpop.f32.mrb[50].mxu0 }
 0x6b7   : > { %v2027_v33 = vmax.f32 %v2019_v37, %v2026_v49  ;;  %v2024_v7 = vpop.f32.mrb[51].mxu0 }
 0x6b8   : > { %v2033_v10 = vmax.f32 %v2021_v51, %v2032_v5 }
 0x6b9   : > { %v2028_v3 = vrot.slane %v2027_v33, 2 }
 0x6ba   : > { %v2034_v32 = vrot.slane %v2033_v10, 2 }
 0x6bb   : > { %v2029_v48 = vmax.f32 %v2027_v33, %v2028_v3 }
 0x6bc   : > { %v2035_v61 = vmax.f32 %v2033_v10, %v2034_v32 }
 0x6bd   : > { %v2030_v58 = vrot.slane %v2029_v48, 1 }
 0x6be   : > { %v2036_v59 = vrot.slane %v2035_v61, 1 }
 0x6bf   : > { %v2031_v23 = vmax.f32 %v2029_v48, %v2030_v58 }
 0x6c0   : > { %v2037_v43 = vmax.f32 %v2035_v61, %v2036_v59 }
 0x6c1   : > { %v2038_v11 = vsub.f32 %v2019_v37, %v2031_v23 }
 0x6c2   : > { %v2039_v62 = vsub.f32 %v2021_v51, %v2037_v43 }
 0x6c3   : > { %v2040_v39 = vmul.f32 1.442695, %v2038_v11 }
 0x6c4   : > { %v2042_v26 = vmul.f32 1.442695, %v2039_v62 }
 0x6c5   : > { %3106 = vpow2.f32 %v2040_v39 }
 0x6c6   : > { %3108 = vpow2.f32 %v2042_v26 }
 0x6cf   : > { %v3107_v41 = vpop.eup %3106 }
 0x6d0   : > { %v3109_v46 = vpop.eup %3108  ;;  %v2056_v30 = vpack.c.bf16 %v3107_v41, %v3107_v41  ;;  %v2044_v28 = vrot.slane %v3107_v41, 4 }
 0x6d1   : > { %v2057_v19 = vpack.c.bf16 %v3109_v46, %v3109_v46  ;;  %v2050_v60 = vrot.slane %v3109_v46, 4 }
 0x6d2   : > { %v2067_v53 = vsel %vm2065_vm3, %v2056_v30, 0  ;;  %v2045_v42 = vadd.f32 %v3107_v41, %v2044_v28 }
 0x6d3   : > { %2881 = vmatprep.subr.msk.bf16.mxu0 %vm2065_vm3, %v2057_v19  ;;  %v2051_v35 = vadd.f32 %v3109_v46, %v2050_v60 }
 0x6d4   : > { %2073 = vmatpush1.bf16.msra.mxu0 %v2067_v53  ;;  %v2046_v55 = vrot.slane %v2045_v42, 2 }
 0x6d5   : > { %v2052_v1 = vrot.slane %v2051_v35, 2 }
 0x6d6   : > { %v2047_v21 = vadd.f32 %v2046_v55, %v2045_v42 }
 0x6d7   : > { %2882 = vmatmul.mubr.msk.bf16.vlgmr.msra.gmra.mrb[52].mxu0 %vm2058_vm4, %v1980_v22  ;;  %v2053_v63 = vadd.f32 %v2052_v1, %v2051_v35 }
 0x6d8   : > { %2114 = vmatprep.mubr.bf16.mxu0 %v4648_v8  ;;  %v2048_v27 = vrot.slane %v2047_v21, 1 }
 0x6d9   : > { %v2054_v40 = vrot.slane %v2053_v63, 1 }
 0x6da   : > { %v2049_v2 = vadd.f32 %v2048_v27, %v2047_v21 }
 0x6db   : > { %v2055_v15 = vadd.f32 %v2054_v40, %v2053_v63 }
 0x6dc   : > { %3110 = vrcp.f32 %v2049_v2 }
 0x6dd   : > { %3112 = vrcp.f32 %v2055_v15 }
 0x6df   : > { %2883 = vmatmul.mubr.msk.bf16.gmra.mrb[56].mxu0 %vm2058_vm4, %v1981_v47 }
 0x6e0   : > { %2717 = vmatprep.mubr.bf16.mxu0 %v4648_v8 }
 0x6e6   : > { %v3111_v16 = vpop.eup %3110 }
 0x6e7   : > { %v3113_v38 = vpop.eup %3112 }
 0x7aa   : > { %v2106_v57 = vpop.f32.mrb[52].mxu0 }
 0x7ab   : > { %v2127_v44 = vmul.f32 %v3111_v16, %v2106_v57  ;;  %v2108_v24 = vpop.f32.mrb[53].mxu0 }
 0x7ac   : > { %v2128_v25 = vmul.f32 %v3113_v38, %v2108_v24  ;;  %v2110_v9 = vpop.f32.mrb[54].mxu0 }
 0x7ad   : > { %v2129_v56 = vmul.f32 %v3111_v16, %v2110_v9  ;;  %v2112_v18 = vpop.f32.mrb[55].mxu0  ;;  %v4299_v52 = vadd.f32 %v2127_v44, %v4207_v50 }
 0x7ae   : > { %v2130_v4 = vmul.f32 %v3113_v38, %v2112_v18  ;;  %v4302_v20 = vadd.f32 %v2128_v25, %v4210_v31 }
 0x7af   : > { %v4293_v13 = vadd.f32 %v2129_v56, %v4201_v45 }
 0x7b0   : > { %v4296_v54 = vadd.f32 %v2130_v4, %v4204_v0  ;;  %v2163_v0 = vmul.f32 %v4299_v52, %v4299_v52  ;;  %v2164_v36 = vmul.f32 %v4302_v20, %v4302_v20 }
 0x7b1   : > { %v2165_v47 = vmul.f32 %v4293_v13, %v4293_v13  ;;  %v2143_v50 = vadd.f32 %v4293_v13, %v4299_v52 }
 0x7b2   : > { %v2116_v12 = vpop.f32.mrb[56].mxu0  ;;  %v2166_v37 = vmul.f32 %v4296_v54, %v4296_v54  ;;  %v2152_v33 = vadd.f32 %v4296_v54, %v4302_v20 }
 0x7b3   : > { %v2131_v14 = vmul.f32 %v3111_v16, %v2116_v12  ;;  %v2118_v22 = vpop.f32.mrb[57].mxu0  ;;  %v2171_v3 = vadd.f32 %v2165_v47, %v2163_v0 }
 0x7b4   : > { %v2132_v45 = vmul.f32 %v3113_v38, %v2118_v22  ;;  %v2120_v49 = vpop.f32.mrb[58].mxu0  ;;  %v2180_v61 = vadd.f32 %v2166_v37, %v2164_v36  ;;  %v2227_v37 = vpop.permute.xlu1 %2226 }
 0x7b5   : > { %v4313_v31 = vadd.f32 %v2131_v14, %v4221_v29  ;;  %v2133_v51 = vmul.f32 %v3111_v16, %v2120_v49  ;;  %v2122_v5 = vpop.f32.mrb[59].mxu0 }
 0x7b6   : > { %v4320_v7 = vadd.f32 %v2132_v45, %v4228_v34  ;;  %v2134_v10 = vmul.f32 %v3113_v38, %v2122_v5  ;;  %v2222_v45 = vpop.permute.xlu0 %2221 }
 0x7b7   : > { %v2144_v32 = vadd.f32 %v2143_v50, %v4313_v31  ;;  %v2167_v48 = vmul.f32 %v4313_v31, %v4313_v31  ;;  %v4326_v29 = vadd.f32 %v2133_v51, %v4234_v6 }
 0x7b8   : > { %v2153_v58 = vadd.f32 %v2152_v33, %v4320_v7  ;;  %v2168_v59 = vmul.f32 %v4320_v7, %v4320_v7  ;;  %v4332_v23 = vadd.f32 %v2134_v10, %v4240_v17  ;;  %v2259_v51 = vpop.permute.xlu1 %2258 }
 0x7b9   : > { %v2172_v34 = vadd.f32 %v2171_v3, %v2167_v48  ;;  %v2145_v43 = vadd.f32 %v2144_v32, %v4326_v29  ;;  %v2169_v11 = vmul.f32 %v4326_v29, %v4326_v29 }
 0x7ba   : > { %v2181_v62 = vadd.f32 %v2180_v61, %v2168_v59  ;;  %v2154_v39 = vadd.f32 %v2153_v58, %v4332_v23  ;;  %v2170_v6 = vmul.f32 %v4332_v23, %v4332_v23  ;;  %v2254_v5 = vpop.permute.xlu0 %2253 }
 0x7bb   : > { %v2146_v26 = vrot.slane %v2145_v43, 4  ;;  %v2173_v41 = vadd.f32 %v2172_v34, %v2169_v11 }
 0x7bc   : > { %v2155_v46 = vrot.slane %v2154_v39, 4  ;;  %v2182_v30 = vadd.f32 %v2181_v62, %v2170_v6  ;;  %v2237_v36 = vpop.permute.xlu1 %2236 }
 0x7bd   : > { %v2147_v19 = vadd.f32 %v2146_v26, %v2145_v43  ;;  %v2174_v53 = vrot.slane %v2173_v41, 4 }
 0x7be   : > { %v2156_v17 = vadd.f32 %v2155_v46, %v2154_v39  ;;  %v2183_v28 = vrot.slane %v2182_v30, 4  ;;  %v2232_v33 = vpop.permute.xlu0 %2231 }
 0x7bf   : > { %v2148_v60 = vrot.slane %v2147_v19, 2  ;;  %v2175_v42 = vadd.f32 %v2174_v53, %v2173_v41 }
 0x7c0   : > { %v2157_v35 = vrot.slane %v2156_v17, 2  ;;  %v2184_v55 = vadd.f32 %v2183_v28, %v2182_v30 }
 0x7c1   : > { %v2149_v1 = vadd.f32 %v2148_v60, %v2147_v19  ;;  %v2176_v21 = vrot.slane %v2175_v42, 2 }
 0x7c2   : > { %v2158_v63 = vadd.f32 %v2157_v35, %v2156_v17  ;;  %v2185_v27 = vrot.slane %v2184_v55, 2 }
 0x7c3   : > { %v2150_v40 = vrot.slane %v2149_v1, 1  ;;  %v2177_v2 = vadd.f32 %v2176_v21, %v2175_v42 }
 0x7c4   : > { %v2159_v15 = vrot.slane %v2158_v63, 1  ;;  %v2186_v16 = vadd.f32 %v2185_v27, %v2184_v55  ;;  %v2269_v55 = vpop.permute.xlu1 %2268 }
 0x7c5   : > { %v2151_v57 = vadd.f32 %v2150_v40, %v2149_v1  ;;  %v2178_v38 = vrot.slane %v2177_v2, 1  ;;  %v2264_v1 = vpop.permute.xlu0 %2263 }
 0x7c6   : > { %v2160_v44 = vadd.f32 %v2159_v15, %v2158_v63  ;;  %v2187_v24 = vrot.slane %v2186_v16, 1 }
 0x7c7   : > { %v2161_v25 = vmul.f32 0.03125, %v2151_v57  ;;  %v2179_v9 = vadd.f32 %v2178_v38, %v2177_v2 }
 0x7c8   : > { %v2162_v56 = vmul.f32 0.03125, %v2160_v44  ;;  %v2188_v18 = vadd.f32 %v2187_v24, %v2186_v16 }
 0x7c9   : > { %v2189_v4 = vmul.f32 0.03125, %v2179_v9  ;;  %v2191_v12 = vmul.f32 %v2161_v25, %v2161_v25  ;;  %v2201_v10 = vsub.f32 %v4326_v29, %v2161_v25  ;;  %v2195_v3 = vsub.f32 %v4299_v52, %v2161_v25 }
 0x7ca   : > { %v2190_v47 = vmul.f32 0.03125, %v2188_v18  ;;  %v2192_v14 = vmul.f32 %v2162_v56, %v2162_v56  ;;  %v2197_v32 = vsub.f32 %v4293_v13, %v2161_v25  ;;  %v2199_v48 = vsub.f32 %v4313_v31, %v2161_v25  ;;  %v2958_v18 = vld [vmem:[%s4474_s12] sm:$0xff]  }
 0x7cb   : > { %v2193_v22 = vsub.f32 %v2189_v4, %v2191_v12  ;;  %v2202_v58 = vsub.f32 %v4332_v23, %v2162_v56  ;;  %v2196_v59 = vsub.f32 %v4302_v20, %v2162_v56  ;;  %v2198_v34 = vsub.f32 %v4296_v54, %v2162_v56  ;;  %v2959_v4 = vld [vmem:[%s4474_s12 + $0x8] sm:$0xff]   ;;  %v2960_v12 = vld [vmem:[%s4474_s12 + $0x10] sm:$0xff]  }
 0x7cc   : > { %v2194_v49 = vsub.f32 %v2190_v47, %v2192_v14  ;;  %v2200_v43 = vsub.f32 %v4320_v7, %v2162_v56  ;;  %v2961_v47 = vld [vmem:[%s4474_s12 + $0x18] sm:$0xff]   ;;  %v2962_v14 = vld [vmem:[%s4474_s12 + $0x20] sm:$0xff]  }
 0x7cd   : > { %v2203_v0 = vadd.f32 1e-05, %v2193_v22  ;;  %v2963_v22 = vld [vmem:[%s4474_s12 + $0x28] sm:$0xff]  }
 0x7ce   : > { %v2204_v50 = vadd.f32 1e-05, %v2194_v49 }
 0x7cf   : > { %3114 = vrsqrt.f32 %v2203_v0 }
 0x7d0   : > { %3116 = vrsqrt.f32 %v2204_v50  ;;  %v2315_v50 = vpop.permute.xlu1 %2314 }
 0x7d9   : > { %v3115_v61 = vpop.eup %3114 }
 0x7da   : > { %v3117_v11 = vpop.eup %3116  ;;  %v2213_v62 = vmul.f32 %v3115_v61, %v2201_v10  ;;  %v2207_v39 = vmul.f32 %v3115_v61, %v2195_v3  ;;  %v2209_v6 = vmul.f32 %v3115_v61, %v2197_v32  ;;  %v2211_v26 = vmul.f32 %v3115_v61, %v2199_v48 }
 0x7db   : > { %v2208_v41 = vmul.f32 %v3117_v11, %v2196_v59  ;;  %v2210_v46 = vmul.f32 %v3117_v11, %v2198_v34  ;;  %v2212_v30 = vmul.f32 %v3117_v11, %v2200_v43  ;;  %v2214_v19 = vmul.f32 %v3117_v11, %v2202_v58  ;;  %v2325_v11 = vpop.permute.xlu1 %2324 }
 0x7dc   : > { %v2239_v53 = vmul.f32 %v2222_v45, %v2207_v39  ;;  %v2241_v17 = vmul.f32 %v2227_v37, %v2209_v6  ;;  %v2243_v27 = vmul.f32 %v2232_v33, %v2211_v26  ;;  %v2245_v40 = vmul.f32 %v2237_v36, %v2213_v62 }
 0x7dd   : > { %v2240_v28 = vmul.f32 %v2222_v45, %v2208_v41  ;;  %v2242_v60 = vmul.f32 %v2227_v37, %v2210_v46  ;;  %v2244_v42 = vmul.f32 %v2232_v33, %v2212_v30  ;;  %v2246_v35 = vmul.f32 %v2237_v36, %v2214_v19  ;;  %v2310_v37 = vpop.permute.xlu0 %2309 }
 0x7de   : > { %v2271_v21 = vadd.f32 %v2254_v5, %v2239_v53  ;;  %v2273_v63 = vadd.f32 %v2259_v51, %v2241_v17  ;;  %v2275_v24 = vadd.f32 %v2264_v1, %v2243_v27  ;;  %v2277_v25 = vadd.f32 %v2269_v55, %v2245_v40 }
 0x7df   : > { %v2272_v2 = vadd.f32 %v2254_v5, %v2240_v28  ;;  %v2274_v15 = vadd.f32 %v2259_v51, %v2242_v60  ;;  %v2276_v16 = vadd.f32 %v2264_v1, %v2244_v42  ;;  %v2278_v57 = vadd.f32 %v2269_v55, %v2246_v35 }
 0x7e0   : > { %v2279_v44 = vpack.c.bf16 %v2273_v63, %v2271_v21  ;;  %v2281_v56 = vpack.c.bf16 %v2277_v25, %v2275_v24 }
 0x7e1   : > { %v2280_v38 = vpack.c.bf16 %v2274_v15, %v2272_v2  ;;  %v2282_v9 = vpack.c.bf16 %v2278_v57, %v2276_v16  ;;  %v2320_v58 = vpop.permute.xlu0 %2319 }
 0x7e3   : > { %2415 = vmatprep.subr.bf16.mxu1 %v2280_v38  ;;  %v2335_v38 = vpop.permute.xlu1 %2334 }
 0x7e4   : > { %2416 = vmatpush1.bf16.msra.mxu1 %v2279_v44 }
 0x7e5   : > { %2417 = vmatprep.subr.bf16.mxu1 %v2282_v9  ;;  %v2330_v60 = vpop.permute.xlu0 %2329 }
 0x7e8   : > { %2418 = vmatpush1.bf16.msra.mxu1 %v2281_v56 }
 0x7eb   : > { %2890 = vmatmul.mubr.msk.bf16.vlgmr.msra.gmra.mrb[64].mxu1 %vm732_vm0, %v2958_v18 }
 0x7ec   : > { %2457 = vmatprep.mubr.bf16.mxu1 %v4648_v8 }
 0x7f3   : > { %2891 = vmatmul.mubr.msk.bf16.gmra.mrb[68].mxu1 %vm732_vm0, %v2959_v4 }
 0x7f4   : > { %2467 = vmatprep.mubr.bf16.mxu1 %v4648_v8 }
 0x7fb   : > { %2892 = vmatmul.mubr.msk.bf16.gmra.mrb[72].mxu1 %vm732_vm0, %v2960_v12 }
 0x7fc   : > { %2477 = vmatprep.mubr.bf16.mxu1 %v4648_v8 }
 0x803   : > { %2893 = vmatmul.mubr.msk.bf16.gmra.mrb[76].mxu1 %vm732_vm0, %v2961_v47 }
 0x804   : > { %2487 = vmatprep.mubr.bf16.mxu1 %v4648_v8 }
 0x80b   : > { %2894 = vmatmul.mubr.msk.bf16.gmra.mrb[80].mxu1 %vm732_vm0, %v2962_v14 }
 0x80c   : > { %2497 = vmatprep.mubr.bf16.mxu1 %v4648_v8 }
 0x813   : > { %2895 = vmatmul.mubr.msk.bf16.gmra.mrb[84].mxu1 %vm732_vm0, %v2963_v22 }
 0x8be   : > { %v2449_v45 = vpop.f32.mrb[64].mxu1 }
 0x8bf   : > { %v2450_v49 = vadd.f32 %v2449_v45, %v2310_v37  ;;  %v2451_v0 = vpop.f32.mrb[65].mxu1 }
 0x8c0   : > { %v2452_v51 = vadd.f32 %v2451_v0, %v2310_v37  ;;  %v2453_v5 = vpop.f32.mrb[66].mxu1 }
 0x8c1   : > { %v2532_v36 = vmul.f32 0.70710677, %v2450_v49  ;;  %v2454_v33 = vadd.f32 %v2453_v5, %v2315_v50  ;;  %v2455_v10 = vpop.f32.mrb[67].mxu1  ;;  %v2508_v40 = vmul.f32 0.5, %v2450_v49 }
 0x8c2   : > { %v2533_v3 = vmul.f32 0.70710677, %v2452_v51  ;;  %v2456_v32 = vadd.f32 %v2455_v10, %v2315_v50  ;;  %v2509_v44 = vmul.f32 0.5, %v2452_v51 }
 0x8c3   : > { %3118 = verf.f32 %v2532_v36  ;;  %v2534_v48 = vmul.f32 0.70710677, %v2454_v33  ;;  %v2510_v2 = vmul.f32 0.5, %v2454_v33  ;;  %v2340_v36 = vpop.permute.xlu0 %2339 }
 0x8c4   : > { %3120 = verf.f32 %v2533_v3  ;;  %v2535_v61 = vmul.f32 0.70710677, %v2456_v32  ;;  %v2511_v24 = vmul.f32 0.5, %v2456_v32 }
 0x8c5   : > { %3122 = verf.f32 %v2534_v48 }
 0x8c6   : > { %3124 = verf.f32 %v2535_v61  ;;  %v2459_v59 = vpop.f32.mrb[68].mxu1 }
 0x8c7   : > { %v2460_v34 = vadd.f32 %v2459_v59, %v2320_v58  ;;  %v2461_v43 = vpop.f32.mrb[69].mxu1 }
 0x8c8   : > { %v4377_v62 = vadd.f32 %v2461_v43, %v2320_v58  ;;  %v2463_v39 = vpop.f32.mrb[70].mxu1 }
 0x8c9   : > { %v2536_v6 = vmul.f32 0.70710677, %v2460_v34  ;;  %v2464_v26 = vadd.f32 %v2463_v39, %v2325_v11  ;;  %v2465_v41 = vpop.f32.mrb[71].mxu1  ;;  %v2512_v59 = vmul.f32 0.5, %v2460_v34 }
 0x8ca   : > { %v2537_v46 = vmul.f32 0.70710677, %v4377_v62  ;;  %v2466_v30 = vadd.f32 %v2465_v41, %v2325_v11  ;;  %v2345_v41 = vpop.permute.xlu1 %2344 }
 0x8cb   : > { %3126 = verf.f32 %v2536_v6  ;;  %v2538_v19 = vmul.f32 0.70710677, %v2464_v26  ;;  %v2514_v43 = vmul.f32 0.5, %v2464_v26 }
 0x8cc   : > { %3128 = verf.f32 %v2537_v46  ;;  %v2539_v53 = vmul.f32 0.70710677, %v2466_v30  ;;  %v2513_v46 = vmul.f32 0.5, %v4377_v62 }
 0x8cd   : > { %v3119_v17 = vpop.eup %3118  ;;  %3130 = verf.f32 %v2538_v19  ;;  %v2515_v19 = vmul.f32 0.5, %v2466_v30 }
 0x8ce   : > { %v3121_v28 = vpop.eup %3120  ;;  %v2580_v42 = vadd.f32 1.0, %v3119_v17  ;;  %3132 = verf.f32 %v2539_v53  ;;  %v2469_v35 = vpop.f32.mrb[72].mxu1 }
 0x8cf   : > { %v3123_v55 = vpop.eup %3122  ;;  %v2581_v1 = vadd.f32 1.0, %v3121_v28  ;;  %v4380_v21 = vadd.f32 %v2469_v35, %v2330_v60  ;;  %v2471_v63 = vpop.f32.mrb[73].mxu1 }
 0x8d0   : > { %v3125_v27 = vpop.eup %3124  ;;  %v2582_v15 = vadd.f32 1.0, %v3123_v55  ;;  %v4382_v16 = vadd.f32 %v2471_v63, %v2330_v60  ;;  %v2473_v57 = vpop.f32.mrb[74].mxu1  ;;  %v2604_v18 = vmul.f32 %v2580_v42, %v2508_v40 }
 0x8d1   : > { %v2583_v25 = vadd.f32 1.0, %v3125_v27  ;;  %v2540_v9 = vmul.f32 0.70710677, %v4380_v21  ;;  %v2475_v56 = vpop.f32.mrb[75].mxu1  ;;  %v4386_v47 = vadd.f32 %v2473_v57, %v2335_v38  ;;  %v2605_v14 = vmul.f32 %v2581_v1, %v2509_v44 }
 0x8d2   : > { %v2606_v4 = vmul.f32 %v2582_v15, %v2510_v2  ;;  %v2541_v12 = vmul.f32 0.70710677, %v4382_v16  ;;  %v4388_v37 = vadd.f32 %v2475_v56, %v2335_v38  ;;  %v2350_v15 = vpop.permute.xlu0 %2349 }
 0x8d3   : > { %v2607_v22 = vmul.f32 %v2583_v25, %v2511_v24  ;;  %3134 = verf.f32 %v2540_v9  ;;  %v2542_v49 = vmul.f32 0.70710677, %v4386_v47  ;;  %v2516_v9 = vmul.f32 0.5, %v4380_v21 }
 0x8d4   : > { %v2632_v45 = vpack.c.bf16 %v2606_v4, %v2604_v18  ;;  %3136 = verf.f32 %v2541_v12  ;;  %v2543_v50 = vmul.f32 0.70710677, %v4388_v37 }
 0x8d5   : > { %v3127_v0 = vpop.eup %3126  ;;  %v2633_v51 = vpack.c.bf16 %v2607_v22, %v2605_v14  ;;  %3138 = verf.f32 %v2542_v49  ;;  %v2355_v14 = vpop.permute.xlu1 %2354  ;;  %v2517_v22 = vmul.f32 0.5, %v4382_v16 }
 0x8d6   : > { %v3129_v5 = vpop.eup %3128  ;;  %v2584_v33 = vadd.f32 1.0, %v3127_v0  ;;  %v2479_v10 = vpop.f32.mrb[76].mxu1  ;;  %3140 = verf.f32 %v2543_v50 }
 0x8d7   : > { %v3131_v3 = vpop.eup %3130  ;;  %v2585_v32 = vadd.f32 1.0, %v3129_v5  ;;  %v4392_v48 = vadd.f32 %v2479_v10, %v2340_v36  ;;  %v2481_v61 = vpop.f32.mrb[77].mxu1  ;;  %2685 = vmatprep.subr.bf16.mxu0 %v2633_v51  ;;  %v2519_v51 = vmul.f32 0.5, %v4388_v37 }
 0x8d8   : > { %v3133_v58 = vpop.eup %3132  ;;  %v2586_v11 = vadd.f32 1.0, %v3131_v3  ;;  %v4394_v39 = vadd.f32 %v2481_v61, %v2340_v36  ;;  %v2483_v6 = vpop.f32.mrb[78].mxu1  ;;  %2686 = vmatpush1.bf16.msra.mxu0 %v2632_v45  ;;  %v2608_v60 = vmul.f32 %v2584_v33, %v2512_v59  ;;  %v2518_v45 = vmul.f32 0.5, %v4386_v47 }
 0x8d9   : > { %v2587_v53 = vadd.f32 1.0, %v3133_v58  ;;  %v2544_v17 = vmul.f32 0.70710677, %v4392_v48  ;;  %v2485_v28 = vpop.f32.mrb[79].mxu1  ;;  %v4399_v55 = vadd.f32 %v2483_v6, %v2345_v41  ;;  %v2609_v34 = vmul.f32 %v2585_v32, %v2513_v46 }
 0x8da   : > { %v2610_v42 = vmul.f32 %v2586_v11, %v2514_v43  ;;  %v2545_v35 = vmul.f32 0.70710677, %v4394_v39  ;;  %v4401_v1 = vadd.f32 %v2485_v28, %v2345_v41  ;;  %v2360_v11 = vpop.permute.xlu0 %2359 }
 0x8db   : > { %v2611_v26 = vmul.f32 %v2587_v53, %v2515_v19  ;;  %3142 = verf.f32 %v2544_v17  ;;  %v2546_v62 = vmul.f32 0.70710677, %v4399_v55  ;;  %v2520_v17 = vmul.f32 0.5, %v4392_v48 }
 0x8dc   : > { %v2634_v63 = vpack.c.bf16 %v2610_v42, %v2608_v60  ;;  %3144 = verf.f32 %v2545_v35  ;;  %v2547_v27 = vmul.f32 0.70710677, %v4401_v1 }
 0x8dd   : > { %v3135_v30 = vpop.eup %3134  ;;  %v2635_v40 = vpack.c.bf16 %v2611_v26, %v2609_v34  ;;  %3146 = verf.f32 %v2546_v62  ;;  %v2365_v34 = vpop.permute.xlu1 %2364  ;;  %v2521_v26 = vmul.f32 0.5, %v4394_v39 }
 0x8de   : > { %v3137_v2 = vpop.eup %3136  ;;  %v2489_v57 = vpop.f32.mrb[80].mxu1  ;;  %v2588_v38 = vadd.f32 1.0, %v3135_v30  ;;  %3148 = verf.f32 %v2547_v27 }
 0x8df   : > { %v4405_v44 = vadd.f32 %v2489_v57, %v2350_v15  ;;  %v2491_v24 = vpop.f32.mrb[81].mxu1  ;;  %2687 = vmatprep.subr.bf16.mxu0 %v2635_v40  ;;  %v3139_v25 = vpop.eup %3138  ;;  %v2589_v56 = vadd.f32 1.0, %v3137_v2  ;;  %v2523_v40 = vmul.f32 0.5, %v4401_v1 }
 0x8e0   : > { %v4408_v18 = vadd.f32 %v2491_v24, %v2350_v15  ;;  %v2493_v4 = vpop.f32.mrb[82].mxu1  ;;  %2688 = vmatpush1.bf16.msra.mxu0 %v2634_v63  ;;  %v3141_v12 = vpop.eup %3140  ;;  %v2590_v49 = vadd.f32 1.0, %v3139_v25  ;;  %v2612_v33 = vmul.f32 %v2588_v38, %v2516_v9  ;;  %v2522_v63 = vmul.f32 0.5, %v4399_v55 }
 0x8e1   : > { %v2548_v0 = vmul.f32 0.70710677, %v4405_v44  ;;  %v2495_v50 = vpop.f32.mrb[83].mxu1  ;;  %v2591_v5 = vadd.f32 1.0, %v3141_v12  ;;  %v2494_v36 = vadd.f32 %v2493_v4, %v2355_v14  ;;  %v2613_v32 = vmul.f32 %v2589_v56, %v2517_v22 }
 0x8e2   : > { %v2549_v21 = vmul.f32 0.70710677, %v4408_v18  ;;  %v2614_v10 = vmul.f32 %v2590_v49, %v2518_v45  ;;  %v2496_v3 = vadd.f32 %v2495_v50, %v2355_v14 }
 0x8e3   : > { %3150 = verf.f32 %v2548_v0  ;;  %v2615_v61 = vmul.f32 %v2591_v5, %v2519_v51  ;;  %v2550_v16 = vmul.f32 0.70710677, %v2494_v36  ;;  %v2524_v0 = vmul.f32 0.5, %v4405_v44 }
 0x8e4   : > { %3152 = verf.f32 %v2549_v21  ;;  %v2636_v47 = vpack.c.bf16 %v2614_v10, %v2612_v33  ;;  %v2551_v59 = vmul.f32 0.70710677, %v2496_v3  ;;  %v2526_v50 = vmul.f32 0.5, %v2494_v36 }
 0x8e5   : > { %v3143_v58 = vpop.eup %3142  ;;  %3154 = verf.f32 %v2550_v16  ;;  %v2637_v37 = vpack.c.bf16 %v2615_v61, %v2613_v32  ;;  %v2525_v5 = vmul.f32 0.5, %v4408_v18  ;;  %v2527_v21 = vmul.f32 0.5, %v2496_v3 }
 0x8e6   : > { %v3145_v43 = vpop.eup %3144  ;;  %v2499_v6 = vpop.f32.mrb[84].mxu1  ;;  %v2592_v41 = vadd.f32 1.0, %v3143_v58  ;;  %3156 = verf.f32 %v2551_v59 }
 0x8e7   : > { %v2500_v46 = vadd.f32 %v2499_v6, %v2360_v11  ;;  %v2501_v19 = vpop.f32.mrb[85].mxu1  ;;  %v3147_v53 = vpop.eup %3146  ;;  %v2593_v28 = vadd.f32 1.0, %v3145_v43  ;;  %2689 = vmatprep.subr.bf16.mxu0 %v2637_v37 }
 0x8e8   : > { %v2502_v60 = vadd.f32 %v2501_v19, %v2360_v11  ;;  %v2503_v42 = vpop.f32.mrb[86].mxu1  ;;  %v3149_v35 = vpop.eup %3148  ;;  %v2594_v62 = vadd.f32 1.0, %v3147_v53  ;;  %2690 = vmatpush1.bf16.msra.mxu0 %v2636_v47  ;;  %v2616_v48 = vmul.f32 %v2592_v41, %v2520_v17 }
 0x8e9   : > { %v2552_v30 = vmul.f32 0.70710677, %v2500_v46  ;;  %v2505_v27 = vpop.f32.mrb[87].mxu1  ;;  %v2595_v2 = vadd.f32 1.0, %v3149_v35  ;;  %v2504_v57 = vadd.f32 %v2503_v42, %v2365_v34  ;;  %v2617_v25 = vmul.f32 %v2593_v28, %v2521_v26 }
 0x8ea   : > { %v2553_v15 = vmul.f32 0.70710677, %v2502_v60  ;;  %v2618_v38 = vmul.f32 %v2594_v62, %v2522_v63  ;;  %v2506_v24 = vadd.f32 %v2505_v27, %v2365_v34  ;;  %v2528_v36 = vmul.f32 0.5, %v2500_v46  ;;  %v2964_v63 = vld [vmem:[%s4476_s14] sm:$0xff]   ;;  %v2965_v46 = vld [vmem:[%s4476_s14 + $0x8] sm:$0xff]  }
 0x8eb   : > { %3158 = verf.f32 %v2552_v30  ;;  %v2619_v9 = vmul.f32 %v2595_v2, %v2523_v40  ;;  %v2554_v56 = vmul.f32 0.70710677, %v2504_v57  ;;  %v2530_v41 = vmul.f32 0.5, %v2504_v57  ;;  %v2656_v40 = vpop.permute.xlu1 %2655 }
 0x8ec   : > { %3160 = verf.f32 %v2553_v15  ;;  %v2638_v4 = vpack.c.bf16 %v2618_v38, %v2616_v48  ;;  %v2555_v55 = vmul.f32 0.70710677, %v2506_v24  ;;  %v2529_v18 = vmul.f32 0.5, %v2502_v60  ;;  %v2651_v60 = vpop.permute.xlu0 %2650 }
 0x8ed   : > { %v3151_v39 = vpop.eup %3150  ;;  %3162 = verf.f32 %v2554_v56  ;;  %v2639_v14 = vpack.c.bf16 %v2619_v9, %v2617_v25  ;;  %v2531_v3 = vmul.f32 0.5, %v2506_v24  ;;  %v3174_v25 = vld [vmem:[%s3322_s30] sm:$0xff] }
 0x8ee   : > { %v3153_v12 = vpop.eup %3152  ;;  %v2596_v22 = vadd.f32 1.0, %v3151_v39  ;;  %3164 = verf.f32 %v2555_v55  ;;  %v3176_v55 = vld [vmem:[%s3322_s30 + $0x10] sm:$0xff] }
 0x8ef   : > { %v3155_v1 = vpop.eup %3154  ;;  %v2597_v45 = vadd.f32 1.0, %v3153_v12  ;;  %2691 = vmatprep.subr.bf16.mxu0 %v2639_v14 }
 0x8f0   : > { %v3157_v49 = vpop.eup %3156  ;;  %v2598_v51 = vadd.f32 1.0, %v3155_v1  ;;  %2692 = vmatpush1.bf16.msra.mxu0 %v2638_v4  ;;  %v2620_v10 = vmul.f32 %v2596_v22, %v2524_v0  ;;  %v2661_v14 = vpop.permute.xlu0 %2660  ;;  %v3177_v22 = vld [vmem:[%s3322_s30 + $0x18] sm:$0xff] }
 0x8f1   : > { %v2599_v33 = vadd.f32 1.0, %v3157_v49  ;;  %v2621_v61 = vmul.f32 %v2597_v45, %v2525_v5 }
 0x8f2   : > { %v2622_v32 = vmul.f32 %v2598_v51, %v2526_v50 }
 0x8f3   : > { %v2623_v16 = vmul.f32 %v2599_v33, %v2527_v21 }
 0x8f4   : > { %v2640_v47 = vpack.c.bf16 %v2622_v32, %v2620_v10  ;;  %v3178_v10 = vld [vmem:[%s3322_s30 + $0x20] sm:$0xff] }
 0x8f5   : > { %v3159_v58 = vpop.eup %3158  ;;  %v2641_v43 = vpack.c.bf16 %v2623_v16, %v2621_v61  ;;  %v3179_v16 = vld [vmem:[%s3322_s30 + $0x28] sm:$0xff] }
 0x8f6   : > { %v3161_v59 = vpop.eup %3160  ;;  %v2600_v11 = vadd.f32 1.0, %v3159_v58 }
 0x8f7   : > { %v3163_v6 = vpop.eup %3162  ;;  %v2601_v37 = vadd.f32 1.0, %v3161_v59  ;;  %2693 = vmatprep.subr.bf16.mxu0 %v2641_v43  ;;  %v3180_v59 = vld [vmem:[%s3322_s30 + $0x30] sm:$0xff] }
 0x8f8   : > { %v3165_v44 = vpop.eup %3164  ;;  %v2602_v19 = vadd.f32 1.0, %v3163_v6  ;;  %2694 = vmatpush1.bf16.msra.mxu0 %v2640_v47  ;;  %v2624_v17 = vmul.f32 %v2600_v11, %v2528_v36 }
 0x8f9   : > { %v2603_v53 = vadd.f32 1.0, %v3165_v44  ;;  %v2625_v42 = vmul.f32 %v2601_v37, %v2529_v18 }
 0x8fa   : > { %v2626_v28 = vmul.f32 %v2602_v19, %v2530_v41 }
 0x8fb   : > { %v2627_v35 = vmul.f32 %v2603_v53, %v2531_v3 }
 0x8fc   : > { %v2642_v34 = vpack.c.bf16 %v2626_v28, %v2624_v17 }
 0x8fd   : > { %v2643_v26 = vpack.c.bf16 %v2627_v35, %v2625_v42 }
 0x8ff   : > { %2695 = vmatprep.subr.bf16.mxu0 %v2643_v26 }
 0x900   : > { %2696 = vmatpush1.bf16.msra.mxu0 %v2642_v34 }
 0x903   : > { %2898 = vmatmul.mubr.msk.bf16.vlgmr.msra.gmra.mrb[60].mxu0 %vm2678_vm5, %v2964_v63 }
 0x904   : > { %2727 = vmatprep.mubr.bf16.mxu0 %v4648_v8 }
 0x90b   : > { %2899 = vmatmul.mubr.msk.bf16.gmra.mrb[64].mxu0 %vm2678_vm5, %v2965_v46 }
 0x9d6   : > { %v2719_v62 = vpop.f32.mrb[60].mxu0 }
 0x9d7   : > { %v2720_v30 = vadd.f32 %v2719_v62, %v2651_v60  ;;  %v2721_v27 = vpop.f32.mrb[61].mxu0 }
 0x9d8   : > { %v2722_v2 = vadd.f32 %v2721_v27, %v2651_v60  ;;  %v2723_v15 = vpop.f32.mrb[62].mxu0 }
 0x9d9   : > { %v2738_v57 = vadd.f32 %v2720_v30, %v4299_v52  ;;  %v2724_v48 = vadd.f32 %v2723_v15, %v2656_v40  ;;  %v2725_v8 = vpop.f32.mrb[63].mxu0  ;;  %v3175_v52 = vld [vmem:[%s3322_s30 + $0x8] sm:$0xff] }
 0x9da   : > { %v2739_v38 = vadd.f32 %v2722_v2, %v4302_v20  ;;  %v2726_v24 = vadd.f32 %v2725_v8, %v2656_v40 }
 0x9db   : > { %v2746_v9 = vadd.f32 %v3174_v25, %v2738_v57  ;;  %v2740_v56 = vadd.f32 %v2724_v48, %v4293_v13  ;;  %v2666_v13 = vpop.permute.xlu1 %2665 }
 0x9dc   : > { %v2747_v39 = vadd.f32 %v3175_v52, %v2739_v38  ;;  %v2741_v4 = vadd.f32 %v2726_v24, %v4296_v54 }
 0x9dd   : > { %2754 = vst [vmem:[%s4434_s20] sm:$0xff] %v2746_v9  ;;  %v2748_v12 = vadd.f32 %v3176_v55, %v2740_v56 }
 0x9de   : > { %2755 = vst [vmem:[%s4434_s20 + $0x8] sm:$0xff] %v2747_v39  ;;  %v2749_v1 = vadd.f32 %v3177_v22, %v2741_v4  ;;  %v2729_v20 = vpop.f32.mrb[64].mxu0 }
 0x9df   : > { %2756 = vst [vmem:[%s4434_s20 + $0x10] sm:$0xff] %v2748_v12  ;;  %v2730_v45 = vadd.f32 %v2729_v20, %v2661_v14  ;;  %v2731_v49 = vpop.f32.mrb[65].mxu0 }
 0x9e0   : > { %2757 = vst [vmem:[%s4434_s20 + $0x18] sm:$0xff] %v2749_v1  ;;  %v2732_v0 = vadd.f32 %v2731_v49, %v2661_v14  ;;  %v2733_v54 = vpop.f32.mrb[66].mxu0 }
 0x9e1   : > { %v2742_v50 = vadd.f32 %v2730_v45, %v4313_v31  ;;  %v2734_v51 = vadd.f32 %v2733_v54, %v2666_v13  ;;  %v2735_v5 = vpop.f32.mrb[67].mxu0  ;;  %v3181_v31 = vld [vmem:[%s3322_s30 + $0x38] sm:$0xff] }
 0x9e2   : > { %v2743_v21 = vadd.f32 %v2732_v0, %v4320_v7  ;;  %v2736_v33 = vadd.f32 %v2735_v5, %v2666_v13 }
 0x9e3   : > { %v2750_v32 = vadd.f32 %v3178_v10, %v2742_v50  ;;  %v2744_v61 = vadd.f32 %v2734_v51, %v4326_v29 }
 0x9e4   : > { %v2751_v58 = vadd.f32 %v3179_v16, %v2743_v21  ;;  %v2745_v47 = vadd.f32 %v2736_v33, %v4332_v23 }
 0x9e5   : > { %2758 = vst [vmem:[%s4434_s20 + $0x20] sm:$0xff] %v2750_v32  ;;  %v2752_v43 = vadd.f32 %v3180_v59, %v2744_v61 }
 0x9e6   : > { %2759 = vst [vmem:[%s4434_s20 + $0x28] sm:$0xff] %v2751_v58  ;;  %v2753_v11 = vadd.f32 %v3181_v31, %v2745_v47 }
 0x9e7   : > { %2760 = vst [vmem:[%s4434_s20 + $0x30] sm:$0xff] %v2752_v43 }
 0x9e8   : > { %2761 = vst [vmem:[%s4434_s20 + $0x38] sm:$0xff] %v2753_v11 }
 0x9e9 PF: > { %s26_s21 = sadd.s32 1, %s3188_s21  }
 0x9ea   : > { %p23_p4 = scmp.ge.s32.totalorder %s26_s21, 4  }
 0x9ec   :  { %25 = sbr.rel (!%p23_p4) target bundleno = 2 (0x2), region = 117 }

</bundles_post_ra>
